<compile_context>
chip_gen: v7x
topology: tpu7x:2x2x1
jax: 0.10.0
libtpu: 0.0.40
codegen_flags: <defaults>
</compile_context>

<pallas_src>
import functools

import jax
import jax.numpy as jnp
from jax.experimental import pallas as pl
from jax.experimental.pallas import tpu as pltpu


def _align_corners_matrix(out_size, in_size):
    """(out_size, in_size) interpolation matrix for bilinear, align_corners=True."""
    if out_size == 1:
        src = jnp.zeros((1,), jnp.float32)
    else:
        src = jnp.arange(out_size, dtype=jnp.float32) * (
            (in_size - 1) / (out_size - 1)
        )
    i0 = jnp.clip(jnp.floor(src), 0, in_size - 1)
    i1 = jnp.clip(i0 + 1, 0, in_size - 1)
    w1 = src - i0
    w0 = 1.0 - w1
    a = (
        jax.nn.one_hot(i0.astype(jnp.int32), in_size) * w0[:, None]
        + jax.nn.one_hot(i1.astype(jnp.int32), in_size) * w1[:, None]
    )
    return a.astype(jnp.float32)


@functools.lru_cache(maxsize=None)
def _composed_resize_operator(h, w, ih, iw, oh, ow):
    """Combined (h*w, oh*ow) operator for resize (h,w)->(ih,iw)->(oh,ow), align_corners.

    Cached across calls (opt #10): the one_hot/kron wrapper graph would otherwise dominate
    steady-state wall clock at these sizes.  kron is quadratic in pixel count — fine for
    the stand-in sizes only (see header TODO for the separable/tiled form).
    """
    hi = jax.lax.Precision.HIGHEST
    ah = jnp.dot(_align_corners_matrix(oh, ih), _align_corners_matrix(ih, h),
                 precision=hi)                                            # (oh, h)
    aw = jnp.dot(_align_corners_matrix(ow, iw), _align_corners_matrix(iw, w),
                 precision=hi)                                            # (ow, w)
    return jnp.kron(ah.T, aw.T)                                           # (h*w, oh*ow)


def _fused_encoder_kernel(x_ref, rk_ref, wc_ref, bc_ref, feat_ref, id_ref, *,
                          n_feat, d_pad, samples, cin, scale_times_ow):
    """Fused per-step: folded 1x1 convs (VPU FMAs at HW_in) -> one MXU resize matmul ->
    bias / ReLU / per-sample max / idepth rescale.

    x_ref   : (S, Cin, HW_in)   S samples per grid step, channels-first, spatial flattened
    rk_ref  : (HW_in, HW_out)   combined resize operator kron(Ah.T, Aw.T) (f32 or bf16)
    wc_ref  : (Dpad, Cin)       folded conv weight: rows [0:D]=features, row D=idepth, rest 0
    bc_ref  : (Dpad, 1)         folded conv bias
    feat_ref: (S, D, HW_out)    features out (lane-dense last dim, unmasked stores)
    id_ref  : (S, 1, HW_out)    idepth out
    """
    wc = wc_ref[...]                                     # (Dpad, Cin)
    rkv = rk_ref[...]                                    # (HW_in, HW_out)

    # Folded 1x1 conv at *input* resolution: Cin = 3 is far too small for the MXU, so three
    # VPU broadcast-FMAs per sample produce (Dpad, HW_in); samples are stacked along the
    # matmul M dimension (Dpad is a multiple of 8, so the concat is aligned vreg assembly).
    parts = []
    for s in range(samples):                             # static unroll (S == 2)
        xs = x_ref[s]                                    # (Cin, HW_in)
        acc = wc[:, 0:1] * xs[0:1, :]
        for c in range(1, cin):
            acc = acc + wc[:, c:c + 1] * xs[c:c + 1, :]
        parts.append(acc)                                # (Dpad, HW_in)
    y = parts[0] if samples == 1 else jnp.concatenate(parts, axis=0)   # (S*Dpad, HW_in)

    # ONE MXU matmul per grid step: M = S*Dpad (e.g. 144) instead of 3; the result is
    # already in a flattened, lane-dense (rows, OH*OW) layout (unmasked stores).
    z = jnp.dot(y.astype(rkv.dtype), rkv,
                preferred_element_type=jnp.float32)      # (S*Dpad, HW_out), f32 accumulate

    bc = bc_ref[...]                                     # (Dpad, 1)
    for s in range(samples):
        zs = z[s * d_pad:s * d_pad + n_feat + 1, :]      # (D+1, HW_out), aligned offset
        feat_ref[s] = zs[:n_feat, :] + bc[:n_feat, :]    # features rows

        # idepth has one channel and the whole spatial extent is in this block, so this
        # per-sample max equals torch.max(idepth.view(bs, -1), dim=1).
        idp = jnp.maximum(zs[n_feat:n_feat + 1, :] + bc[n_feat:n_feat + 1, :], 0.0)
        m = jnp.max(idp, axis=-1, keepdims=True) + 1e-8
        inv = pl.reciprocal(m, approx=True) * scale_times_ow    # divide -> EUP, scale folded
        id_ref[s] = idp * inv + 0.01


class DefomEncoderPallas:
    _MODEL_CONFIGS = {
        "vits": {"features": 64, "out_channels": [48, 96, 192, 384]},
        "vitb": {"features": 128, "out_channels": [96, 192, 384, 768]},
        "vitl": {"features": 256, "out_channels": [256, 512, 1024, 1024]},
        "vitg": {"features": 384, "out_channels": [1536, 1536, 1536, 1536]},
    }

    def __init__(self, dinov2_encoder="vits", idepth_scale=0.25, key=None,
                 use_bf16_resize=False):
        if key is None:
            key = jax.random.PRNGKey(0)
        cfg = self._MODEL_CONFIGS[dinov2_encoder]
        self.out_dim = cfg["features"]
        self.idepth_scale = float(idepth_scale)
        self.use_bf16_resize = use_bf16_resize
        k1, k2 = jax.random.split(key)
        d, cin = self.out_dim, 3
        hi = jax.lax.Precision.HIGHEST

        # Deterministic synthetic parameters for the depth_anything stand-in.
        # TODO(synk): real DepthAnythingV2 ViT/DPT weights & architecture not reimplemented.
        self.feat_w_t = 0.1 * jax.random.normal(k1, (d, cin), jnp.float32)   # (D, Cin)
        self.feat_b = jnp.zeros((d, 1), jnp.float32)                         # (D, 1)
        self.idepth_w_t = 0.1 * jax.random.normal(k2, (d, 1), jnp.float32)   # (D, 1)
        self.idepth_b = jnp.full((1, 1), 0.1, jnp.float32)                   # (1, 1)

        # Fold both 1x1 convs into one (D+1)-row combined weight/bias (perf opt #1):
        #   rows [0:D] -> features;  row D -> idepth (pre-ReLU).
        wc = jnp.concatenate(
            [self.feat_w_t,
             jnp.dot(self.idepth_w_t.T, self.feat_w_t, precision=hi)], axis=0)      # (D+1, Cin)
        bc = jnp.concatenate(
            [self.feat_b,
             jnp.dot(self.idepth_w_t.T, self.feat_b, precision=hi) + self.idepth_b],
            axis=0)                                                                   # (D+1, 1)
        # Pad rows to a sublane multiple so per-sample stacking stays 8-aligned.
        self.d_pad = ((d + 1 + 7) // 8) * 8
        self.wc_pad = jnp.zeros((self.d_pad, cin), jnp.float32).at[:d + 1].set(wc)
        self.bc_pad = jnp.zeros((self.d_pad, 1), jnp.float32).at[:d + 1].set(bc)

    def __call__(self, x_list, danv2_io_sizes):
        # x = torch.cat(x, dim=0)
        x = jnp.concatenate([xi.astype(jnp.float32) for xi in x_list], axis=0)
        n2, cin, h, w = x.shape
        ih, iw, oh, ow = (int(s) for s in danv2_io_sizes)
        d, d_pad = self.out_dim, self.d_pad
        hw_in, hw_out = h * w, oh * ow

        # Both align_corners resizes compose exactly into one per-axis linear map.
        rk = _composed_resize_operator(h, w, ih, iw, oh, ow)
        if self.use_bf16_resize:
            # ~2-3x MXU throughput + half the rk DMA/VMEM bytes; accumulation stays f32.
            rk = rk.astype(jnp.bfloat16)

        # 2 samples per grid step (opt #2): M = 2*Dpad rows per matmul, and the 2-step
        # "parallel" grid keeps both v7x TensorCores busy (opt #3).
        samples = 2 if n2 % 2 == 0 else 1
        x_blk = x.reshape(n2, cin, hw_in)    # trailing-dim merge only, no data movement

        features_flat, idepth_flat = pl.pallas_call(
            functools.partial(
                _fused_encoder_kernel,
                n_feat=d, d_pad=d_pad, samples=samples, cin=cin,
                scale_times_ow=self.idepth_scale * float(ow),
            ),
            out_shape=(
                jax.ShapeDtypeStruct((n2, d, hw_out), jnp.float32),
                jax.ShapeDtypeStruct((n2, 1, hw_out), jnp.float32),
            ),
            grid=(n2 // samples,),
            in_specs=[
                pl.BlockSpec((samples, cin, hw_in), lambda i: (i, 0, 0)),
                # Grid-invariant operands (constant index_maps).  TODO(synk): at real
                # resolutions single-buffer these (pipeline_mode=pl.Buffered(1)) and tile
                # HW_out for v7x's 64 MiB VMEM via the separable two-matmul form.
                pl.BlockSpec((hw_in, hw_out), lambda i: (0, 0)),
                pl.BlockSpec((d_pad, cin), lambda i: (0, 0)),
                pl.BlockSpec((d_pad, 1), lambda i: (0, 0)),
            ],
            out_specs=(
                pl.BlockSpec((samples, d, hw_out), lambda i: (i, 0, 0)),
                pl.BlockSpec((samples, 1, hw_out), lambda i: (i, 0, 0)),
            ),
            compiler_params=pltpu.CompilerParams(
                dimension_semantics=("parallel",),
                vmem_limit_bytes=32 * 1024 * 1024,   # explicit headroom (v5e default is 16 MiB)
            ),
        )(x_blk, rk, self.wc_pad, self.bc_pad)

        # Free reshapes back to public NCHW (split of the trailing dim only).
        features = features_flat.reshape(n2, d, oh, ow)
        idepth = idepth_flat.reshape(n2, 1, oh, ow)
        left_feat = features[: n2 // 2]
        right_feat = features[n2 // 2:]
        return features, left_feat, right_feat, idepth


if __name__ == "__main__":
    key = jax.random.PRNGKey(0)
    k_left, k_right, k_params = jax.random.split(key, 3)

    B, C, H, W = 2, 3, 16, 16
    left = jax.random.normal(k_left, (B, C, H, W), jnp.float32)
    right = jax.random.normal(k_right, (B, C, H, W), jnp.float32)

    # (ih, iw, oh, ow): ih/iw multiples of 14 (DA-V2 convention); oh*ow -> lane-dense outputs.
    danv2_io_sizes = (28, 28, 16, 16)

    enc = DefomEncoderPallas("vits", idepth_scale=0.25, key=k_params)
    features, left_feat, right_feat, idepth = enc([left, right], danv2_io_sizes)
    jax.block_until_ready((features, left_feat, right_feat, idepth))

    assert features.shape == (2 * B, 64, 16, 16)
    assert left_feat.shape == (B, 64, 16, 16)
    assert right_feat.shape == (B, 64, 16, 16)
    assert idepth.shape == (2 * B, 1, 16, 16)

    # ---- pure-JAX reference (sequential resizes, unfused convs; same math) ----
    hi = jax.lax.Precision.HIGHEST
    x_cat = jnp.concatenate([left, right], axis=0)
    ih, iw, oh, ow = danv2_io_sizes
    a1h = _align_corners_matrix(ih, H)
    a1w = _align_corners_matrix(iw, W)
    a2h = _align_corners_matrix(oh, ih)
    a2w = _align_corners_matrix(ow, iw)
    x1 = jnp.einsum("ph,nchw,qw->ncpq", a1h, x_cat, a1w, precision=hi)
    xo = jnp.einsum("ap,ncpq,bq->ncab", a2h, x1, a2w, precision=hi)
    f_ref = (jnp.einsum("dc,ncab->ndab", enc.feat_w_t, xo, precision=hi)
             + enc.feat_b.reshape(1, -1, 1, 1))
    z_ref = (jnp.einsum("d,ndab->nab", enc.idepth_w_t[:, 0], f_ref, precision=hi)[:, None]
             + enc.idepth_b[0, 0])
    z_ref = jnp.maximum(z_ref, 0.0)
    m_ref = jnp.max(z_ref.reshape(z_ref.shape[0], -1), axis=1).reshape(-1, 1, 1, 1) + 1e-8
    id_ref = z_ref / m_ref * enc.idepth_scale * ow + 0.01

    assert jnp.allclose(features, f_ref, rtol=2e-3, atol=2e-3), "features mismatch (f32)"
    # idepth tolerance leaves headroom for pl.reciprocal(approx=True) (~2^-12 rel error).
    assert jnp.allclose(idepth, id_ref, rtol=2e-3, atol=5e-3), "idepth mismatch (f32)"

    # ---- gated bf16 resize-operator path (perf opt #5): run + looser numerical check ----
    enc_bf16 = DefomEncoderPallas("vits", idepth_scale=0.25, key=k_params,
                                  use_bf16_resize=True)
    f_b, _, _, id_b = enc_bf16([left, right], danv2_io_sizes)
    jax.block_until_ready((f_b, id_b))
    assert jnp.allclose(f_b, f_ref, rtol=3e-2, atol=3e-2), "features mismatch (bf16)"
    assert jnp.allclose(id_b, id_ref, rtol=5e-2, atol=1e-1), "idepth mismatch (bf16)"

    print("KERNEL_OK")
</pallas_src>

<mosaic_0001>
module attributes {stable_mosaic.version = 11 : i64} {
  func.func @_fused_encoder_kernel(%arg0: i32, %arg1: memref<2x3x256xf32, #tpu.memory_space<vmem>>, %arg2: memref<256x256xf32, #tpu.memory_space<vmem>>, %arg3: memref<72x3xf32, #tpu.memory_space<vmem>>, %arg4: memref<72x1xf32, #tpu.memory_space<vmem>>, %arg5: memref<2x64x256xf32, #tpu.memory_space<vmem>>, %arg6: memref<2x1x256xf32, #tpu.memory_space<vmem>>) attributes {dimension_semantics = [#tpu.dimension_semantics<parallel>], iteration_bounds = array<i64: 2>, scalar_prefetch = 0 : i64, scratch_operands = 0 : i64, tpu.core_type = #tpu.core_type<tc>, window_params = [{transform_indices = @transform_0, window_bounds = array<i64: 2, 3, 256>}, {pipeline_mode = #tpu.pipeline_mode<synchronous>, transform_indices = @transform_1, window_bounds = array<i64: 256, 256>}, {pipeline_mode = #tpu.pipeline_mode<synchronous>, transform_indices = @transform_2, window_bounds = array<i64: 72, 3>}, {pipeline_mode = #tpu.pipeline_mode<synchronous>, transform_indices = @transform_3, window_bounds = array<i64: 72, 1>}, {transform_indices = @transform_4, window_bounds = array<i64: 2, 64, 256>}, {transform_indices = @transform_5, window_bounds = array<i64: 2, 1, 256>}]} {
    %c0 = arith.constant 0 : index
    %c0_0 = arith.constant 0 : index
    %0 = vector.load %arg3[%c0, %c0_0] : memref<72x3xf32, #tpu.memory_space<vmem>>, vector<72x3xf32>
    %c0_1 = arith.constant 0 : index
    %c0_2 = arith.constant 0 : index
    %1 = vector.load %arg2[%c0_1, %c0_2] : memref<256x256xf32, #tpu.memory_space<vmem>>, vector<256x256xf32>
    %c0_3 = arith.constant 0 : index
    %c0_4 = arith.constant 0 : index
    %c0_5 = arith.constant 0 : index
    %2 = vector.load %arg1[%c0_3, %c0_4, %c0_5] : memref<2x3x256xf32, #tpu.memory_space<vmem>>, vector<1x3x256xf32>
    %3 = vector.shape_cast %2 : vector<1x3x256xf32> to vector<3x256xf32>
    %4 = vector.extract_strided_slice %0 {offsets = [0, 0], sizes = [72, 1], strides = [1, 1]} : vector<72x3xf32> to vector<72x1xf32>
    %5 = vector.extract_strided_slice %3 {offsets = [0, 0], sizes = [1, 256], strides = [1, 1]} : vector<3x256xf32> to vector<1x256xf32>
    %6 = vector.broadcast %4 : vector<72x1xf32> to vector<72x256xf32>
    %7 = vector.broadcast %5 : vector<1x256xf32> to vector<72x256xf32>
    %8 = arith.mulf %6, %7 : vector<72x256xf32>
    %9 = vector.extract_strided_slice %0 {offsets = [0, 1], sizes = [72, 1], strides = [1, 1]} : vector<72x3xf32> to vector<72x1xf32>
    %10 = vector.extract_strided_slice %3 {offsets = [1, 0], sizes = [1, 256], strides = [1, 1]} : vector<3x256xf32> to vector<1x256xf32>
    %11 = vector.broadcast %9 : vector<72x1xf32> to vector<72x256xf32>
    %12 = vector.broadcast %10 : vector<1x256xf32> to vector<72x256xf32>
    %13 = arith.mulf %11, %12 : vector<72x256xf32>
    %14 = arith.addf %8, %13 : vector<72x256xf32>
    %15 = vector.extract_strided_slice %0 {offsets = [0, 2], sizes = [72, 1], strides = [1, 1]} : vector<72x3xf32> to vector<72x1xf32>
    %16 = vector.extract_strided_slice %3 {offsets = [2, 0], sizes = [1, 256], strides = [1, 1]} : vector<3x256xf32> to vector<1x256xf32>
    %17 = vector.broadcast %15 : vector<72x1xf32> to vector<72x256xf32>
    %18 = vector.broadcast %16 : vector<1x256xf32> to vector<72x256xf32>
    %19 = arith.mulf %17, %18 : vector<72x256xf32>
    %20 = arith.addf %14, %19 : vector<72x256xf32>
    %c1 = arith.constant 1 : index
    %c0_6 = arith.constant 0 : index
    %c0_7 = arith.constant 0 : index
    %21 = vector.load %arg1[%c1, %c0_6, %c0_7] : memref<2x3x256xf32, #tpu.memory_space<vmem>>, vector<1x3x256xf32>
    %22 = vector.shape_cast %21 : vector<1x3x256xf32> to vector<3x256xf32>
    %23 = vector.extract_strided_slice %0 {offsets = [0, 0], sizes = [72, 1], strides = [1, 1]} : vector<72x3xf32> to vector<72x1xf32>
    %24 = vector.extract_strided_slice %22 {offsets = [0, 0], sizes = [1, 256], strides = [1, 1]} : vector<3x256xf32> to vector<1x256xf32>
    %25 = vector.broadcast %23 : vector<72x1xf32> to vector<72x256xf32>
    %26 = vector.broadcast %24 : vector<1x256xf32> to vector<72x256xf32>
    %27 = arith.mulf %25, %26 : vector<72x256xf32>
    %28 = vector.extract_strided_slice %0 {offsets = [0, 1], sizes = [72, 1], strides = [1, 1]} : vector<72x3xf32> to vector<72x1xf32>
    %29 = vector.extract_strided_slice %22 {offsets = [1, 0], sizes = [1, 256], strides = [1, 1]} : vector<3x256xf32> to vector<1x256xf32>
    %30 = vector.broadcast %28 : vector<72x1xf32> to vector<72x256xf32>
    %31 = vector.broadcast %29 : vector<1x256xf32> to vector<72x256xf32>
    %32 = arith.mulf %30, %31 : vector<72x256xf32>
    %33 = arith.addf %27, %32 : vector<72x256xf32>
    %34 = vector.extract_strided_slice %0 {offsets = [0, 2], sizes = [72, 1], strides = [1, 1]} : vector<72x3xf32> to vector<72x1xf32>
    %35 = vector.extract_strided_slice %22 {offsets = [2, 0], sizes = [1, 256], strides = [1, 1]} : vector<3x256xf32> to vector<1x256xf32>
    %36 = vector.broadcast %34 : vector<72x1xf32> to vector<72x256xf32>
    %37 = vector.broadcast %35 : vector<1x256xf32> to vector<72x256xf32>
    %38 = arith.mulf %36, %37 : vector<72x256xf32>
    %39 = arith.addf %33, %38 : vector<72x256xf32>
    %40 = tpu.concatenate %20, %39 in 0 : vector<72x256xf32>, vector<72x256xf32> -> vector<144x256xf32>
    %cst = arith.constant dense<0.000000e+00> : vector<144x256xf32>
    %41 = tpu.matmul %40, %1, %cst {dimension_numbers = #tpu.dot_dimension_numbers<[1], [0], [0], [1], [0, 0, 1, 1], [], []>} : vector<144x256xf32>, vector<256x256xf32>, vector<144x256xf32> -> vector<144x256xf32>
    %c0_8 = arith.constant 0 : index
    %c0_9 = arith.constant 0 : index
    %42 = vector.load %arg4[%c0_8, %c0_9] : memref<72x1xf32, #tpu.memory_space<vmem>>, vector<72x1xf32>
    %43 = vector.extract_strided_slice %41 {offsets = [0, 0], sizes = [65, 256], strides = [1, 1]} : vector<144x256xf32> to vector<65x256xf32>
    %44 = vector.extract_strided_slice %43 {offsets = [0, 0], sizes = [64, 256], strides = [1, 1]} : vector<65x256xf32> to vector<64x256xf32>
    %45 = vector.extract_strided_slice %42 {offsets = [0, 0], sizes = [64, 1], strides = [1, 1]} : vector<72x1xf32> to vector<64x1xf32>
    %46 = vector.broadcast %45 : vector<64x1xf32> to vector<64x256xf32>
    %47 = arith.addf %44, %46 : vector<64x256xf32>
    %c0_10 = arith.constant 0 : index
    %c0_11 = arith.constant 0 : index
    %c0_12 = arith.constant 0 : index
    %48 = vector.load %arg5[%c0_10, %c0_11, %c0_12] : memref<2x64x256xf32, #tpu.memory_space<vmem>>, vector<1x64x256xf32>
    %49 = vector.shape_cast %48 : vector<1x64x256xf32> to vector<64x256xf32>
    %50 = vector.shape_cast %47 : vector<64x256xf32> to vector<1x64x256xf32>
    tpu.vector_store %arg5[%c0_10, %c0_11, %c0_12], %50 {strides = array<i32>} : memref<2x64x256xf32, #tpu.memory_space<vmem>>, vector<1x64x256xf32>,
    %51 = vector.extract_strided_slice %43 {offsets = [64, 0], sizes = [1, 256], strides = [1, 1]} : vector<65x256xf32> to vector<1x256xf32>
    %52 = vector.extract_strided_slice %42 {offsets = [64, 0], sizes = [1, 1], strides = [1, 1]} : vector<72x1xf32> to vector<1x1xf32>
    %53 = vector.broadcast %52 : vector<1x1xf32> to vector<1x256xf32>
    %54 = arith.addf %51, %53 : vector<1x256xf32>
    %cst_13 = arith.constant 0.000000e+00 : f32
    %55 = vector.broadcast %cst_13 : f32 to vector<1x256xf32>
    %56 = arith.maximumf %54, %55 : vector<1x256xf32>
    %cst_14 = arith.constant dense<0xFF800000> : vector<1xf32>
    %57 = vector.multi_reduction <maximumf>, %56, %cst_14 [1] : vector<1x256xf32> to vector<1xf32>
    %58 = vector.shape_cast %57 : vector<1xf32> to vector<1x1xf32>
    %cst_15 = arith.constant 9.99999993E-9 : f32
    %59 = vector.broadcast %cst_15 : f32 to vector<1x1xf32>
    %60 = arith.addf %58, %59 : vector<1x1xf32>
    %61 = tpu.reciprocal %60 {approx = true} : vector<1x1xf32> -> vector<1x1xf32>
    %cst_16 = arith.constant 4.000000e+00 : f32
    %62 = vector.broadcast %cst_16 : f32 to vector<1x1xf32>
    %63 = arith.mulf %61, %62 : vector<1x1xf32>
    %64 = vector.broadcast %63 : vector<1x1xf32> to vector<1x256xf32>
    %65 = arith.mulf %56, %64 : vector<1x256xf32>
    %cst_17 = arith.constant 0.00999999977 : f32
    %66 = vector.broadcast %cst_17 : f32 to vector<1x256xf32>
    %67 = arith.addf %65, %66 : vector<1x256xf32>
    %c0_18 = arith.constant 0 : index
    %c0_19 = arith.constant 0 : index
    %c0_20 = arith.constant 0 : index
    %68 = vector.load %arg6[%c0_18, %c0_19, %c0_20] : memref<2x1x256xf32, #tpu.memory_space<vmem>>, vector<1x1x256xf32>
    %69 = vector.shape_cast %68 : vector<1x1x256xf32> to vector<1x256xf32>
    %70 = vector.shape_cast %67 : vector<1x256xf32> to vector<1x1x256xf32>
    tpu.vector_store %arg6[%c0_18, %c0_19, %c0_20], %70 {strides = array<i32>} : memref<2x1x256xf32, #tpu.memory_space<vmem>>, vector<1x1x256xf32>,
    %71 = vector.extract_strided_slice %41 {offsets = [72, 0], sizes = [65, 256], strides = [1, 1]} : vector<144x256xf32> to vector<65x256xf32>
    %72 = vector.extract_strided_slice %71 {offsets = [0, 0], sizes = [64, 256], strides = [1, 1]} : vector<65x256xf32> to vector<64x256xf32>
    %73 = vector.extract_strided_slice %42 {offsets = [0, 0], sizes = [64, 1], strides = [1, 1]} : vector<72x1xf32> to vector<64x1xf32>
    %74 = vector.broadcast %73 : vector<64x1xf32> to vector<64x256xf32>
    %75 = arith.addf %72, %74 : vector<64x256xf32>
    %c1_21 = arith.constant 1 : index
    %c0_22 = arith.constant 0 : index
    %c0_23 = arith.constant 0 : index
    %76 = vector.load %arg5[%c1_21, %c0_22, %c0_23] : memref<2x64x256xf32, #tpu.memory_space<vmem>>, vector<1x64x256xf32>
    %77 = vector.shape_cast %76 : vector<1x64x256xf32> to vector<64x256xf32>
    %78 = vector.shape_cast %75 : vector<64x256xf32> to vector<1x64x256xf32>
    tpu.vector_store %arg5[%c1_21, %c0_22, %c0_23], %78 {strides = array<i32>} : memref<2x64x256xf32, #tpu.memory_space<vmem>>, vector<1x64x256xf32>,
    %79 = vector.extract_strided_slice %71 {offsets = [64, 0], sizes = [1, 256], strides = [1, 1]} : vector<65x256xf32> to vector<1x256xf32>
    %80 = vector.extract_strided_slice %42 {offsets = [64, 0], sizes = [1, 1], strides = [1, 1]} : vector<72x1xf32> to vector<1x1xf32>
    %81 = vector.broadcast %80 : vector<1x1xf32> to vector<1x256xf32>
    %82 = arith.addf %79, %81 : vector<1x256xf32>
    %cst_24 = arith.constant 0.000000e+00 : f32
    %83 = vector.broadcast %cst_24 : f32 to vector<1x256xf32>
    %84 = arith.maximumf %82, %83 : vector<1x256xf32>
    %cst_25 = arith.constant dense<0xFF800000> : vector<1xf32>
    %85 = vector.multi_reduction <maximumf>, %84, %cst_25 [1] : vector<1x256xf32> to vector<1xf32>
    %86 = vector.shape_cast %85 : vector<1xf32> to vector<1x1xf32>
    %cst_26 = arith.constant 9.99999993E-9 : f32
    %87 = vector.broadcast %cst_26 : f32 to vector<1x1xf32>
    %88 = arith.addf %86, %87 : vector<1x1xf32>
    %89 = tpu.reciprocal %88 {approx = true} : vector<1x1xf32> -> vector<1x1xf32>
    %cst_27 = arith.constant 4.000000e+00 : f32
    %90 = vector.broadcast %cst_27 : f32 to vector<1x1xf32>
    %91 = arith.mulf %89, %90 : vector<1x1xf32>
    %92 = vector.broadcast %91 : vector<1x1xf32> to vector<1x256xf32>
    %93 = arith.mulf %84, %92 : vector<1x256xf32>
    %cst_28 = arith.constant 0.00999999977 : f32
    %94 = vector.broadcast %cst_28 : f32 to vector<1x256xf32>
    %95 = arith.addf %93, %94 : vector<1x256xf32>
    %c1_29 = arith.constant 1 : index
    %c0_30 = arith.constant 0 : index
    %c0_31 = arith.constant 0 : index
    %96 = vector.load %arg6[%c1_29, %c0_30, %c0_31] : memref<2x1x256xf32, #tpu.memory_space<vmem>>, vector<1x1x256xf32>
    %97 = vector.shape_cast %96 : vector<1x1x256xf32> to vector<1x256xf32>
    %98 = vector.shape_cast %95 : vector<1x256xf32> to vector<1x1x256xf32>
    tpu.vector_store %arg6[%c1_29, %c0_30, %c0_31], %98 {strides = array<i32>} : memref<2x1x256xf32, #tpu.memory_space<vmem>>, vector<1x1x256xf32>,
    return
  }
  func.func @transform_0(%arg0: i32) -> (i32, i32, i32) {
    %c0_i32 = arith.constant 0 : i32
    %c0_i32_0 = arith.constant 0 : i32
    %c0_i32_1 = arith.constant 0 : i32
    return %arg0, %c0_i32, %c0_i32_0 : i32, i32, i32
  }
  func.func @transform_1(%arg0: i32) -> (i32, i32) {
    %c0_i32 = arith.constant 0 : i32
    %c0_i32_0 = arith.constant 0 : i32
    %c0_i32_1 = arith.constant 0 : i32
    return %c0_i32, %c0_i32_0 : i32, i32
  }
  func.func @transform_2(%arg0: i32) -> (i32, i32) {
    %c0_i32 = arith.constant 0 : i32
    %c0_i32_0 = arith.constant 0 : i32
    %c0_i32_1 = arith.constant 0 : i32
    return %c0_i32, %c0_i32_0 : i32, i32
  }
  func.func @transform_3(%arg0: i32) -> (i32, i32) {
    %c0_i32 = arith.constant 0 : i32
    %c0_i32_0 = arith.constant 0 : i32
    %c0_i32_1 = arith.constant 0 : i32
    return %c0_i32, %c0_i32_0 : i32, i32
  }
  func.func @transform_4(%arg0: i32) -> (i32, i32, i32) {
    %c0_i32 = arith.constant 0 : i32
    %c0_i32_0 = arith.constant 0 : i32
    %c0_i32_1 = arith.constant 0 : i32
    return %arg0, %c0_i32, %c0_i32_0 : i32, i32, i32
  }
  func.func @transform_5(%arg0: i32) -> (i32, i32, i32) {
    %c0_i32 = arith.constant 0 : i32
    %c0_i32_0 = arith.constant 0 : i32
    %c0_i32_1 = arith.constant 0 : i32
    return %arg0, %c0_i32, %c0_i32_0 : i32, i32, i32
  }
}

</mosaic_0001>

<bundles_post_ra>
// kernel: tpu_custom_call.1
= control target key start
LH: loop header
LB: loop body
LE: loop exit
PB: predicated region body
PF: predicated region fallthrough
CT: control target
= control target key end

     0   :  { %11 = vsyncpa [#allocation3], 0  ;;  %s2154_s0 = inlined_call_operand.vmem [shape: f32[4,3,256], index: 0, kind: input, shape index: {}]   ;;  %s2155_s1 = inlined_call_operand.hbm [shape: f32[256,256], index: 1, kind: input, shape index: {}]   ;;  %s2156_s2 = inlined_call_operand.vmem [shape: f32[72,3], index: 2, kind: input, shape index: {}]   ;;  %s2157_s3 = inlined_call_operand.vmem [shape: f32[72,1], index: 3, kind: input, shape index: {}]   ;;  %s2158_s4 = inlined_call_operand.hbm [shape: f32[4,64,256], index: 4, kind: output, shape index: {0}]   ;;  %s2159_s5 = inlined_call_operand.hbm [shape: f32[4,1,256], index: 5, kind: output, shape index: {1}]  }
   0x1   :  { %12 = vsyncpa [#allocation4], 0 }
   0x2   :  { %14 = vsyncpa [#allocation4 + $0x1], 0 }
   0x3   :  { %15 = vsyncpa [#allocation7], 0 }
   0x4   :  { %17 = vsyncpa [#allocation7 + $0x1], 0  ;;  %s1654_s18 = smov 0   ;;  %s1656_s19 = smov 0  }
   0x5   :  { %s1658_s20 = smov 0   ;;  %s1660_s21 = smov 0  }
   0x6 LB: > { %s1675_s22 = sadd.s32 4294967295, %s1609_s21   ;;  %s1250_s23 = sadd.s32 4294967294, %s1609_s21   ;;  %s1609_s21 = sphi %s1660_s21, %s2175_s21   ;;  %s1605_s20 = sphi %s1658_s20, %s2174_s20   ;;  %s1601_s19 = sphi %s1656_s19, %s2173_s19   ;;  %s1597_s18 = sphi %s1654_s18, %s2172_s18  }
   0x7   : > { %s1679_s24 = sadd.s32 1, %s1609_s21   ;;  %s119_s25 = sadd.s32 1, %s1605_s20 }
   0x8   : > { %s116_s26 = ssub.s32 %s1609_s21, %s1679_s24  ;;  %p129_p0 = scmp.ne.s32.totalorder %s1605_s20, %s1601_s19 }
   0x9   : > { %p117_p1 = scmp.eq.s32.totalorder %s116_s26, 0  ;;  %p130_p2 = scmp.eq.s32.totalorder %s1675_s22, 1 }
   0xa   : > { %p135_p3 = scmp.ne.s32.totalorder %s1601_s19, %s1597_s18  ;;  %p136_p4 = scmp.eq.s32.totalorder %s1250_s23, 1 }
   0xb   : > { %s1690_s27 = scalar_select %p117_p1, %s1605_s20, %s119_s25  }
   0xc   : > { %p1692_p5 = por %p130_p2, %p129_p0  ;;  %p1696_p6 = por %p136_p4, %p135_p3 }
   0xd   : > { %p1251_p7 = scmp.ge.s32.totalorder %s1609_s21, 1  ;;  %p169_p8 = scmp.lt.s32.totalorder %s1609_s21, 3 }
   0xe   : > { %s2163_s28 = scalar_select %p1692_p5, 1, 0 }
   0xf   : > { %s2164_s29 = scalar_select %p1696_p6, 1, 0 }
  0x10   : > { %p2160_p9 = scmp.eq.s32.totalorder %s1675_s22, 0  ;;  %p1703_p10 = pnand %p1251_p7, %p169_p8 }
  0x11   : > { %s1611_s6 = smov [#allocation2]   ;;  %s1483_s11 = scalar_lea.hbm %s2155_s1, 8192 }
  0x12   : > { %s2165_s30 = scalar_select %p1703_p10, 1, 0 }
  0x13   : > { %s181_s7 = sshll.u32 %s1611_s6, 4  ;;  %p1398_p11 = pneg %p1703_p10  ;;  %s182_s7 = int_to_ptr.vmem [resolvable:$true] %s181_s7 }
  0x14   : > { %p1484_p13 = scmp.ne.s32.totalorder %s2155_s1, %s1483_s11  ;;  %p1490_p3 = scmp.lt.u32.totalorder %s1483_s11, %s2155_s1 }
  0x15   : > { %p1711_p12 = pnand %p2160_p9, %p1398_p11 }
  0x17   : > { %p1485_p0 = pneg %p1711_p12 }
  0x19   : > { %p1486_p1 = pnand %p1485_p0, %p1484_p13 }
  0x1b   : > { %p1487_p2 = pneg %p1486_p1 }
  0x1d   : > { %p1492_p4 = pnand %p1490_p3, %p1487_p2 }
  0x1f   : > { %1495 = shalt.err (!%p1492_p4)
}
  0x20   : > { %s1496_s16 = scalar_lea.vmem %s182_s7, 8192  ;;  %p1504_p9 = scmp.lt.s32.totalorder %s182_s7, %s182_s7 }
  0x21   : > { %p1497_p7 = scmp.ne.s32.totalorder %s182_s7, %s1496_s16  ;;  %p1505_p6 = scmp.lt.s32.totalorder %s1496_s16, %s1496_s16 }
  0x23   : > { %p1499_p8 = pnand %p1497_p7, %p1485_p0  ;;  %p1506_p5 = por %p1505_p6, %p1504_p9 }
  0x25   : > { %p1500_p11 = pneg %p1499_p8 }
  0x27   : > { %p1507_p10 = pnand %p1506_p5, %p1500_p11 }
  0x29   : > { %1510 = shalt.err (!%p1507_p10)
}
  0x2a   : > { %s1612_s17 = smov 256   ;;  %s1613_s23 = smov 16  }
  0x2b   : > { %1401 = dma.hbm_to_vmem [thread:$0]  (!%p1711_p12), %s2155_s1, 8192, %s182_s7, [#allocation3], %s1612_s17, %s1612_s17, %s1613_s23  }
  0x2c   : > { %p2167_p13 = scmp.ne.s32.totalorder %s2165_s30, 0 }
  0x2d   : > { %p2168_p1 = scmp.eq.s32.totalorder (!%p2167_p13), %s1675_s22, 0 }
  0x2e   : > { %213 = sbr.rel (%p2167_p13) target bundleno = 679 (0x2a7), region = 36 }
  0x35   : > { %1584 = dma.done.wait (%p2168_p1), [#allocation3], 8192   ;;  %p2169_p0 = pmov %p2168_p1 }
  0x36   : > { %v1614_v0 = vmov 2   ;;  %v1615_v1 = vmov 0   ;;  %v256_v2 = vld [vmem:[%s2156_s2] sm:$0xff]  ;;  %v257_v3 = vld [vmem:[%s2156_s2 + $0x8] sm:$0xff]  ;;  %v268_v5 = vld [vmem:[#allocation2 + $0x18] sm:$0xff]  ;;  %v1616_v22 = vmov 1  }
  0x37   : > { %1586 = vsyncadd (%p2169_p0), [#allocation3], 4294959104  ;;  %1456 = vset.pattern.permute.xlu1 %v1614_v0  ;;  %1455 = vset.pattern.permute.xlu0 %v1615_v1  ;;  %v266_v4 = vld [vmem:[#allocation2 + $0x8] sm:$0xff]  ;;  %v265_v6 = vld [vmem:[#allocation2] sm:$0xff]  ;;  %s1258_s6 = sshll.u32 %s1675_s22, 1  ;;  %s1982_s10 = sand.u32 1, %s1601_s19  }
  0x38   : > { %503 = vperm.xlu1 %1456, %v256_v2   ;;  %332 = vperm.xlu0 %1455, %v256_v2   ;;  %v1294_v7 = vpack.c.bf16 %v268_v5, %v266_v4  ;;  %v267_v8 = vld [vmem:[#allocation2 + $0x10] sm:$0xff]  ;;  %v270_v9 = vld [vmem:[#allocation2 + $0x28] sm:$0xff]  ;;  %v272_v10 = vld [vmem:[#allocation2 + $0x38] sm:$0xff]  ;;  %p248_p5 = scmp.lt.s32.totalorder %s1258_s6, 3  ;;  %s1256_s11 = sshll.u32 %s1982_s10, 8  ;;  %vm1002_vm0 = vcmask 1040384  }
  0x39   : > { %v1296_v11 = vpack.c.bf16 %v267_v8, %v265_v6  ;;  %v1298_v12 = vpack.c.bf16 %v272_v10, %v270_v9  ;;  %v269_v13 = vld [vmem:[#allocation2 + $0x20] sm:$0xff]  ;;  %v271_v14 = vld [vmem:[#allocation2 + $0x30] sm:$0xff]  ;;  %v274_v15 = vld [vmem:[#allocation2 + $0x48] sm:$0xff]  ;;  %s1993_s12 = scalar_lea.vmem [#allocation5], %s1256_s11  ;;  %s1291_s17 = sshll.u32 %s1675_s22, 12 }
  0x3a   : > { %v276_v16 = vld [vmem:[#allocation2 + $0x58] sm:$0xff]  ;;  %v258_v17 = vld [vmem:[%s2156_s2 + $0x10] sm:$0xff]  ;;  %1295 = vmatprep.subr.bf16.mxu0 %v1294_v7  ;;  %1358 = vmatprep.subr.bf16.mxu1 %v1294_v7  ;;  %v1300_v18 = vpack.c.bf16 %v271_v14, %v269_v13  ;;  %v273_v20 = vld [vmem:[#allocation2 + $0x40] sm:$0xff]  ;;  %s2177_s6 = smov (!%p248_p5, %s1258_s6), 3  ;;  %s1127_s23 = sshll.u32 %s1993_s12, 4  ;;  %s2060_s23 = int_to_ptr.vmem [resolvable:$true] %s1127_s23 }
  0x3b   : > { %1297 = vmatpush1.bf16.msra.mxu0 %v1296_v11  ;;  %1374 = vmatpush1.bf16.msra.mxu1 %v1296_v11  ;;  %v1302_v19 = vpack.c.bf16 %v276_v16, %v274_v15  ;;  %v275_v21 = vld [vmem:[#allocation2 + $0x50] sm:$0xff]  ;;  %v278_v23 = vld [vmem:[#allocation2 + $0x68] sm:$0xff]  ;;  %v280_v24 = vld [vmem:[#allocation2 + $0x78] sm:$0xff]  ;;  %s1289_s8 = sshll.u32 %s2177_s6, 3  ;;  %s2058_s6 = scalar_lea.hbm %s2158_s4, %s1291_s17 }
  0x3c   : > { %1457 = vset.pattern.permute.xlu1 %v1615_v1  ;;  %1459 = vset.pattern.permute.xlu0 %v1614_v0  ;;  %v1304_v25 = vpack.c.bf16 %v275_v21, %v273_v20  ;;  %v1306_v26 = vpack.c.bf16 %v280_v24, %v278_v23  ;;  %v277_v27 = vld [vmem:[#allocation2 + $0x60] sm:$0xff]  ;;  %v279_v28 = vld [vmem:[#allocation2 + $0x70] sm:$0xff]  ;;  %v282_v29 = vld [vmem:[#allocation2 + $0x88] sm:$0xff]  ;;  %s252_s9 = scalar_lea.vmem %s2154_s0, %s1289_s8  ;;  %s1108_s8 = scalar_lea.sflag [#allocation4], %s1982_s10 }
  0x3d   : > { %337 = vperm.xlu1 %1457, %v257_v3   ;;  %507 = vperm.xlu0 %1459, %v257_v3   ;;  %v284_v30 = vld [vmem:[#allocation2 + $0x98] sm:$0xff]  ;;  %v1308_v32 = vpack.c.bf16 %v279_v28, %v277_v27  ;;  %v281_v33 = vld [vmem:[#allocation2 + $0x80] sm:$0xff]  ;;  %v283_v34 = vld [vmem:[#allocation2 + $0x90] sm:$0xff]  ;;  %s1511_s30 = scalar_lea.vmem %s2060_s23, 4096  ;;  %p2170_p9 = scmp.ne.s32.totalorder %s2163_s28, 0 }
  0x3e   : > { %1299 = vmatprep.subr.bf16.mxu0 %v1298_v12  ;;  %1359 = vmatprep.subr.bf16.mxu1 %v1298_v12  ;;  %v259_v31 = vld [vmem:[%s2156_s2 + $0x18] sm:$0xff]  ;;  %v1310_v35 = vpack.c.bf16 %v284_v30, %v282_v29  ;;  %v286_v36 = vld [vmem:[#allocation2 + $0xa8] sm:$0xff]  ;;  %v1760_v38 = vld [vmem:[%s2156_s2 + $0x20] sm:$0xff]  ;;  %v1312_v39 = vpack.c.bf16 %v283_v34, %v281_v33  ;;  %p1512_p6 = scmp.ne.s32.totalorder %s2060_s23, %s1511_s30  ;;  %s1618_s7 = smov [#allocation5]  }
  0x3f   : > { %1301 = vmatpush1.bf16.msra.mxu0 %v1300_v18  ;;  %1375 = vmatpush1.bf16.msra.mxu1 %v1300_v18  ;;  %v288_v37 = vld [vmem:[#allocation2 + $0xb8] sm:$0xff]  ;;  %v285_v40 = vld [vmem:[#allocation2 + $0xa0] sm:$0xff]  ;;  %v287_v41 = vld [vmem:[#allocation2 + $0xb0] sm:$0xff] }
  0x40   : > { %1303 = vmatprep.subr.bf16.mxu0 %v1302_v19  ;;  %1360 = vmatprep.subr.bf16.mxu1 %v1302_v19  ;;  %v1314_v42 = vpack.c.bf16 %v288_v37, %v286_v36  ;;  %v290_v43 = vld [vmem:[#allocation2 + $0xc8] sm:$0xff]  ;;  %v292_v44 = vld [vmem:[#allocation2 + $0xd8] sm:$0xff]  ;;  %v1316_v45 = vpack.c.bf16 %v287_v41, %v285_v40  ;;  %v289_v48 = vld [vmem:[#allocation2 + $0xc0] sm:$0xff]  ;;  %p1513_p10 = pnand %p1512_p6, %p2170_p9 }
  0x41   : > { %1458 = vset.pattern.permute.xlu1 %v1616_v22  ;;  %511 = vperm.xlu0 %1459, %v258_v17   ;;  %v1767_v46 = vld [vmem:[%s2156_s2 + $0x28] sm:$0xff]  ;;  %v1318_v47 = vpack.c.bf16 %v292_v44, %v290_v43  ;;  %v291_v49 = vld [vmem:[#allocation2 + $0xd0] sm:$0xff]  ;;  %v296_v51 = vld [vmem:[#allocation2 + $0xf8] sm:$0xff] }
  0x42   : > { %417 = vperm.xlu1 %1458, %v257_v3   ;;  %v294_v50 = vld [vmem:[#allocation2 + $0xe8] sm:$0xff]  ;;  %v1320_v52 = vpack.c.bf16 %v291_v49, %v289_v48  ;;  %v1774_v53 = vld [vmem:[%s2156_s2 + $0x30] sm:$0xff]  ;;  %v293_v55 = vld [vmem:[#allocation2 + $0xe0] sm:$0xff]  ;;  %p1514_p12 = pneg %p1513_p10 }
  0x43   : > { %1305 = vmatpush1.bf16.msra.mxu0 %v1304_v25  ;;  %1376 = vmatpush1.bf16.msra.mxu1 %v1304_v25  ;;  %v1322_v54 = vpack.c.bf16 %v296_v51, %v294_v50  ;;  %v295_v56 = vld [vmem:[#allocation2 + $0xf0] sm:$0xff]  ;;  %v298_v57 = vld [vmem:[#allocation2 + $0x108] sm:$0xff]  ;;  %v300_v58 = vld [vmem:[#allocation2 + $0x118] sm:$0xff]  ;;  %v376_v51 = vlaneseq }
  0x44   : > { %1307 = vmatprep.subr.bf16.mxu0 %v1306_v26  ;;  %1361 = vmatprep.subr.bf16.mxu1 %v1306_v26  ;;  %v1324_v59 = vpack.c.bf16 %v295_v56, %v293_v55  ;;  %v1326_v60 = vpack.c.bf16 %v300_v58, %v298_v57  ;;  %v297_v61 = vld [vmem:[#allocation2 + $0x100] sm:$0xff]  ;;  %v299_v62 = vld [vmem:[#allocation2 + $0x110] sm:$0xff]  ;;  %v302_v63 = vld [vmem:[#allocation2 + $0x128] sm:$0xff] }
  0x45   : > { %1462 = vset.pattern.permute.xlu0 %v1616_v22  ;;  %v1328_v3 = vpack.c.bf16 %v299_v62, %v297_v61  ;;  %v1786_v5 = vld [vmem:[%s2156_s2 + $0x38] sm:$0xff]  ;;  %v301_v6 = vld [vmem:[#allocation2 + $0x120] sm:$0xff]  ;;  %v303_v7 = vld [vmem:[#allocation2 + $0x130] sm:$0xff] }
  0x46   : > { %1460 = vset.pattern.permute.xlu1 %v1615_v1  ;;  %413 = vperm.xlu0 %1462, %v256_v2   ;;  %v304_v2 = vld [vmem:[#allocation2 + $0x138] sm:$0xff]  ;;  %v306_v8 = vld [vmem:[#allocation2 + $0x148] sm:$0xff]  ;;  %v1793_v10 = vld [vmem:[%s2156_s2 + $0x40] sm:$0xff]  ;;  %v1332_v11 = vpack.c.bf16 %v303_v7, %v301_v6 }
  0x47   : > { %342 = vperm.xlu1 %1460, %v258_v17   ;;  %1309 = vmatpush1.bf16.msra.mxu0 %v1308_v32  ;;  %v1330_v4 = vpack.c.bf16 %v304_v2, %v302_v63  ;;  %v308_v9 = vld [vmem:[#allocation2 + $0x158] sm:$0xff]  ;;  %v305_v13 = vld [vmem:[#allocation2 + $0x140] sm:$0xff]  ;;  %v307_v14 = vld [vmem:[#allocation2 + $0x150] sm:$0xff] }
  0x48   : > { %1377 = vmatpush1.bf16.msra.mxu1 %v1308_v32  ;;  %1311 = vmatprep.subr.bf16.mxu0 %v1310_v35  ;;  %v1334_v12 = vpack.c.bf16 %v308_v9, %v306_v8  ;;  %v310_v15 = vld [vmem:[#allocation2 + $0x168] sm:$0xff]  ;;  %v312_v16 = vld [vmem:[#allocation2 + $0x178] sm:$0xff]  ;;  %v309_v19 = vld [vmem:[#allocation2 + $0x160] sm:$0xff] }
  0x49   : > { %1362 = vmatprep.subr.bf16.mxu1 %v1310_v35  ;;  %v1338_v18 = vpack.c.bf16 %v312_v16, %v310_v15  ;;  %v311_v20 = vld [vmem:[#allocation2 + $0x170] sm:$0xff]  ;;  %v314_v21 = vld [vmem:[#allocation2 + $0x188] sm:$0xff]  ;;  %v316_v23 = vld [vmem:[#allocation2 + $0x198] sm:$0xff] }
  0x4a   : > { %425 = vperm.xlu0 %1462, %v259_v31   ;;  %v1340_v24 = vpack.c.bf16 %v311_v20, %v309_v19  ;;  %v313_v25 = vld [vmem:[#allocation2 + $0x180] sm:$0xff]  ;;  %v315_v26 = vld [vmem:[#allocation2 + $0x190] sm:$0xff]  ;;  %v1342_v27 = vpack.c.bf16 %v316_v23, %v314_v21  ;;  %v318_v28 = vld [vmem:[#allocation2 + $0x1a8] sm:$0xff] }
  0x4b   : > { %1461 = vset.pattern.permute.xlu1 %v1616_v22  ;;  %1313 = vmatpush1.bf16.msra.mxu0 %v1312_v39  ;;  %v320_v29 = vld [vmem:[#allocation2 + $0x1b8] sm:$0xff]  ;;  %v1344_v30 = vpack.c.bf16 %v315_v26, %v313_v25  ;;  %v319_v32 = vld [vmem:[#allocation2 + $0x1b0] sm:$0xff]  ;;  %v322_v34 = vld [vmem:[#allocation2 + $0x1c8] sm:$0xff] }
  0x4c   : > { %421 = vperm.xlu1 %1461, %v258_v17   ;;  %1378 = vmatpush1.bf16.msra.mxu1 %v1312_v39  ;;  %v1336_v17 = vpack.c.bf16 %v307_v14, %v305_v13  ;;  %v1346_v33 = vpack.c.bf16 %v320_v29, %v318_v28  ;;  %v324_v35 = vld [vmem:[#allocation2 + $0x1d8] sm:$0xff]  ;;  %v323_v39 = vld [vmem:[#allocation2 + $0x1d0] sm:$0xff]  ;;  %v326_v40 = vld [vmem:[#allocation2 + $0x1e8] sm:$0xff] }
  0x4d   : > { %1315 = vmatprep.subr.bf16.mxu0 %v1314_v42  ;;  %1363 = vmatprep.subr.bf16.mxu1 %v1314_v42  ;;  %v1350_v37 = vpack.c.bf16 %v324_v35, %v322_v34  ;;  %v328_v41 = vld [vmem:[#allocation2 + $0x1f8] sm:$0xff]  ;;  %v325_v44 = vld [vmem:[#allocation2 + $0x1e0] sm:$0xff]  ;;  %v914_v48 = vld [vmem:[%s2157_s3 + $0x10] sm:$0xff] }
  0x4e   : > { %429 = vperm.xlu0 %1462, %v1760_v38   ;;  %v1354_v43 = vpack.c.bf16 %v328_v41, %v326_v40  ;;  %v917_v49 = vld [vmem:[%s2157_s3 + $0x28] sm:$0xff]  ;;  %v918_v50 = vld [vmem:[%s2157_s3 + $0x30] sm:$0xff] }
  0x4f   : > { %1317 = vmatpush1.bf16.msra.mxu0 %v1316_v45  ;;  %v1261_v55 = vld [vmem:[%s252_s9 + $0x8] sm:$0x77] }
  0x50   : > { %1463 = vset.pattern.permute.xlu1 %v1615_v1  ;;  %1379 = vmatpush1.bf16.msra.mxu1 %v1316_v45  ;;  %v327_v45 = vld [vmem:[#allocation2 + $0x1f0] sm:$0xff] }
  0x51   : > { %347 = vperm.xlu1 %1463, %v259_v31   ;;  %1319 = vmatprep.subr.bf16.mxu0 %v1318_v47 }
  0x52   : > { %1467 = vset.pattern.permute.xlu0 %v1615_v1  ;;  %1364 = vmatprep.subr.bf16.mxu1 %v1318_v47  ;;  %v913_v47 = vld [vmem:[%s2157_s3 + $0x8] sm:$0xff] }
  0x53   : > { %357 = vperm.xlu0 %1467, %v1767_v46   ;;  %1321 = vmatpush1.bf16.msra.mxu0 %v1320_v52 }
  0x54   : > { %1380 = vmatpush1.bf16.msra.mxu1 %v1320_v52  ;;  %1323 = vmatprep.subr.bf16.mxu0 %v1322_v54  ;;  %v1836_v52 = vshrl.u32 %v376_v51, 7 }
  0x55   : > { %1464 = vset.pattern.permute.xlu1 %v1614_v0  ;;  %1365 = vmatprep.subr.bf16.mxu1 %v1322_v54  ;;  %v329_v54 = vld [vmem:[%s252_s9] sm:$0x77]  ;;  %s1515_s9 = sshll.u32 %s1618_s7, 4  ;;  %s1516_s9 = int_to_ptr.vmem [resolvable:$false] %s1515_s9 }
  0x56   : > { %515 = vperm.xlu1 %1464, %v259_v31   ;;  %v317_v31 = vld [vmem:[#allocation2 + $0x1a0] sm:$0xff]  ;;  %v544_v56 = vsub.s32 6, %v1836_v52  ;;  %v378_v58 = vsub.s32 0, %v1836_v52  ;;  %v454_v61 = vsub.s32 5, %v1836_v52  ;;  %v450_v62 = vsub.s32 1, %v1836_v52  ;;  %s1517_s11 = scalar_lea.vmem %s1516_s9, 8192  ;;  %p1518_p2 = scmp.lt.s32.totalorder %s2060_s23, %s1516_s9 }
  0x57   : > { %362 = vperm.xlu0 %1467, %v1774_v53   ;;  %1325 = vmatpush1.bf16.msra.mxu0 %v1324_v59  ;;  %v1348_v36 = vpack.c.bf16 %v319_v32, %v317_v31  ;;  %p1519_p3 = scmp.lt.s32.totalorder %s1517_s11, %s1511_s30 }
  0x58   : > { %1381 = vmatpush1.bf16.msra.mxu1 %v1324_v59  ;;  %1327 = vmatprep.subr.bf16.mxu0 %v1326_v60  ;;  %v598_v6 = vrot.slane %v1261_v55, %v378_v58  ;;  %v455_v8 = vrot.slane %v329_v54, %v454_v61  ;;  %v634_v13 = vrot.slane %v1261_v55, %v450_v62 }
  0x59   : > { %1366 = vmatprep.subr.bf16.mxu1 %v1326_v60  ;;  %v382_v60 = vsub.s32 4, %v1836_v52  ;;  %v638_v14 = vrot.slane %v1261_v55, %v454_v61  ;;  %p1520_p4 = por %p1519_p3, %p1518_p2 }
  0x5a   : > { %1465 = vset.pattern.permute.xlu1 %v1615_v1  ;;  %v1857_v20 = vrot.slane %v598_v6, %v378_v58  ;;  %v1861_v23 = vrot.slane %v455_v8, %v450_v62  ;;  %v1867_v26 = vrot.slane %v634_v13, %v450_v62 }
  0x5b   : > { %352 = vperm.xlu1 %1465, %v1760_v38   ;;  %1471 = vset.pattern.permute.xlu0 %v1614_v0  ;;  %v383_v7 = vrot.slane %v329_v54, %v382_v60  ;;  %v602_v9 = vrot.slane %v1261_v55, %v382_v60  ;;  %p1521_p7 = pnand %p1520_p4, %p1514_p12 }
  0x5c   : > { %527 = vperm.xlu0 %1471, %v1774_v53   ;;  %1329 = vmatpush1.bf16.msra.mxu0 %v1328_v3 }
  0x5d   : > { %1382 = vmatpush1.bf16.msra.mxu1 %v1328_v3  ;;  %1331 = vmatprep.subr.bf16.mxu0 %v1330_v4  ;;  %v545_v3 = vrot.slane %v329_v54, %v544_v56  ;;  %v1859_v21 = vrot.slane %v383_v7, %v378_v58 }
  0x5e   : > { %1367 = vmatprep.subr.bf16.mxu1 %v1330_v4  ;;  %v692_v4 = vrot.slane %v1261_v55, %v544_v56 }
  0x5f   : > { %1466 = vset.pattern.permute.xlu1 %v1614_v0 }
  0x60   : > { %519 = vperm.xlu1 %1466, %v1760_v38   ;;  %531 = vperm.xlu0 %1471, %v1786_v5   ;;  %v321_v38 = vld [vmem:[#allocation2 + $0x1c0] sm:$0xff] }
  0x61   : > { %1333 = vmatpush1.bf16.msra.mxu0 %v1332_v11  ;;  %1383 = vmatpush1.bf16.msra.mxu1 %v1332_v11  ;;  %v1352_v42 = vpack.c.bf16 %v323_v39, %v321_v38 }
  0x62   : > { %1335 = vmatprep.subr.bf16.mxu0 %v1334_v12  ;;  %1368 = vmatprep.subr.bf16.mxu1 %v1334_v12  ;;  %v451_v12 = vrot.slane %v329_v54, %v450_v62 }
  0x64   : > { %1468 = vset.pattern.permute.xlu1 %v1616_v22  ;;  %1475 = vset.pattern.permute.xlu0 %v1616_v22  ;;  %v1865_v25 = vrot.slane %v451_v12, %v450_v62 }
  0x65   : > { %433 = vperm.xlu1 %1468, %v1767_v46   ;;  %445 = vperm.xlu0 %1475, %v1793_v10  }
  0x66   : > { %1337 = vmatpush1.bf16.msra.mxu0 %v1336_v17  ;;  %1384 = vmatpush1.bf16.msra.mxu1 %v1336_v17 }
  0x67   : > { %1339 = vmatprep.subr.bf16.mxu0 %v1338_v18  ;;  %1369 = vmatprep.subr.bf16.mxu1 %v1338_v18 }
  0x69   : > { %1469 = vset.pattern.permute.xlu1 %v1614_v0  ;;  %1478 = vset.pattern.permute.xlu0 %v1615_v1 }
  0x6a   : > { %523 = vperm.xlu1 %1469, %v1767_v46   ;;  %1341 = vmatpush1.bf16.msra.mxu0 %v1340_v24  ;;  %v1356_v46 = vpack.c.bf16 %v327_v45, %v325_v44 }
  0x6b   : > { %1385 = vmatpush1.bf16.msra.mxu1 %v1340_v24  ;;  %1343 = vmatprep.subr.bf16.mxu0 %v1342_v27  ;;  %v1863_v24 = vrot.slane %v602_v9, %v378_v58 }
  0x6c   : > { %1370 = vmatprep.subr.bf16.mxu1 %v1342_v27  ;;  %v1869_v27 = vrot.slane %v638_v14, %v450_v62 }
  0x6e   : > { %1470 = vset.pattern.permute.xlu1 %v1616_v22  ;;  %1345 = vmatpush1.bf16.msra.mxu0 %v1344_v30 }
  0x6f   : > { %437 = vperm.xlu1 %1470, %v1774_v53   ;;  %1386 = vmatpush1.bf16.msra.mxu1 %v1344_v30  ;;  %v540_v53 = vsub.s32 2, %v1836_v52 }
  0x70   : > { %1347 = vmatprep.subr.bf16.mxu0 %v1346_v33  ;;  %1371 = vmatprep.subr.bf16.mxu1 %v1346_v33 }
  0x71   : > { %v541_v63 = vrot.slane %v329_v54, %v540_v53  ;;  %v688_v2 = vrot.slane %v1261_v55, %v540_v53  ;;  %v1851_v17 = vrot.slane %v545_v3, %v540_v53  ;;  %v1853_v18 = vrot.slane %v692_v4, %v540_v53 }
  0x72   : > { %1349 = vmatpush1.bf16.msra.mxu0 %v1348_v36 }
  0x73   : > { %1472 = vset.pattern.permute.xlu1 %v1615_v1  ;;  %1387 = vmatpush1.bf16.msra.mxu1 %v1348_v36  ;;  %v1847_v15 = vrot.slane %v541_v63, %v540_v53  ;;  %v1849_v16 = vrot.slane %v688_v2, %v540_v53 }
  0x74   : > { %367 = vperm.xlu1 %1472, %v1786_v5   ;;  %1351 = vmatprep.subr.bf16.mxu0 %v1350_v37 }
  0x75   : > { %1372 = vmatprep.subr.bf16.mxu1 %v1350_v37 }
  0x76   : > { %1353 = vmatpush1.bf16.msra.mxu0 %v1352_v42 }
  0x77   : > { %1388 = vmatpush1.bf16.msra.mxu1 %v1352_v42  ;;  %1355 = vmatprep.subr.bf16.mxu0 %v1354_v43 }
  0x78   : > { %1473 = vset.pattern.permute.xlu1 %v1616_v22  ;;  %1373 = vmatprep.subr.bf16.mxu1 %v1354_v43  ;;  %v920_v22 = vld [vmem:[%s2157_s3 + $0x40] sm:$0xff] }
  0x79   : > { %441 = vperm.xlu1 %1473, %v1786_v5   ;;  %v379_v5 = vrot.slane %v329_v54, %v378_v58 }
  0x7a   : > { %1357 = vmatpush1.bf16.msra.mxu0 %v1356_v46 }
  0x7b   : > { %1389 = vmatpush1.bf16.msra.mxu1 %v1356_v46  ;;  %v1855_v19 = vrot.slane %v379_v5, %v378_v58 }
  0x7d   : > { %1474 = vset.pattern.permute.xlu1 %v1615_v1 }
  0x7e   : > { %372 = vperm.xlu1 %1474, %v1793_v10  }
  0x82   : > { %1476 = vset.pattern.permute.xlu1 %v1614_v0  ;;  %v915_v0 = vld [vmem:[%s2157_s3 + $0x18] sm:$0xff] }
  0x83   : > { %535 = vperm.xlu1 %1476, %v1793_v10  }
  0x87   : > { %1477 = vset.pattern.permute.xlu1 %v1615_v1  ;;  %v916_v1 = vld [vmem:[%s2157_s3 + $0x20] sm:$0xff] }
  0x88   : > { %995 = vperm.xlu1 %1477, %v920_v22  }
  0x8c   : > { %928 = vperm.xlu1 %1477, %v913_v47  }
  0x90   : > { %933 = vperm.xlu1 %1477, %v914_v48  }
  0x94   : > { %938 = vperm.xlu1 %1477, %v915_v0  }
  0x98   : > { %943 = vperm.xlu1 %1477, %v916_v1  }
  0x9c   : > { %948 = vperm.xlu1 %1477, %v917_v49  }
  0xa0   : > { %953 = vperm.xlu1 %1477, %v918_v50  }
  0xb7   : > { %v504_v57 = vpop.permute.xlu1 %503  ;;  %v333_v59 = vpop.permute.xlu0 %332 }
  0xb8   : > { %v556_v29 = vmul.f32 %v1847_v15, %v504_v57  ;;  %v703_v30 = vmul.f32 %v1849_v16, %v504_v57  ;;  %v394_v31 = vmul.f32 %v1855_v19, %v333_v59  ;;  %v613_v32 = vmul.f32 %v1857_v20, %v333_v59 }
  0xb9   : > { %v395_v34 = vmul.f32 %v1859_v21, %v333_v59  ;;  %v557_v35 = vmul.f32 %v1851_v17, %v504_v57  ;;  %v614_v36 = vmul.f32 %v1863_v24, %v333_v59  ;;  %v704_v37 = vmul.f32 %v1853_v18, %v504_v57 }
  0xbc   : > { %v338_v10 = vpop.permute.xlu1 %337  ;;  %v508_v11 = vpop.permute.xlu0 %507 }
  0xbd   : > { %v396_v38 = vmul.f32 %v1855_v19, %v338_v10  ;;  %v397_v39 = vmul.f32 %v1859_v21, %v338_v10  ;;  %v615_v40 = vmul.f32 %v1857_v20, %v338_v10  ;;  %v616_v42 = vmul.f32 %v1863_v24, %v338_v10 }
  0xbe   : > { %v558_v43 = vmul.f32 %v1847_v15, %v508_v11  ;;  %v559_v44 = vmul.f32 %v1851_v17, %v508_v11  ;;  %v705_v45 = vmul.f32 %v1849_v16, %v508_v11  ;;  %v706_v46 = vmul.f32 %v1853_v18, %v508_v11 }
  0xc0   : > { %v512_v28 = vpop.permute.xlu0 %511 }
  0xc1   : > { %v418_v33 = vpop.permute.xlu1 %417  ;;  %v560_v55 = vmul.f32 %v1847_v15, %v512_v28  ;;  %v561_v56 = vmul.f32 %v1851_v17, %v512_v28  ;;  %v707_v57 = vmul.f32 %v1849_v16, %v512_v28  ;;  %v708_v63 = vmul.f32 %v1853_v18, %v512_v28 }
  0xc2   : > { %v469_v41 = vmul.f32 %v1861_v23, %v418_v33  ;;  %v468_v22 = vmul.f32 %v1865_v25, %v418_v33  ;;  %v651_v47 = vmul.f32 %v1867_v26, %v418_v33  ;;  %v652_v48 = vmul.f32 %v1869_v27, %v418_v33 }
  0xc4   : > { %v487_v58 = vadd.f32 %v469_v41, %v397_v39  ;;  %v670_v2 = vadd.f32 %v652_v48, %v616_v42  ;;  %v486_v3 = vadd.f32 %v468_v22, %v396_v38  ;;  %v669_v4 = vadd.f32 %v651_v47, %v615_v40 }
  0xc5   : > { %v414_v0 = vpop.permute.xlu0 %413 }
  0xc6   : > { %v466_v1 = vmul.f32 %v1865_v25, %v414_v0  ;;  %v649_v49 = vmul.f32 %v1867_v26, %v414_v0  ;;  %v343_v50 = vpop.permute.xlu1 %342  ;;  %v467_v53 = vmul.f32 %v1861_v23, %v414_v0  ;;  %v650_v54 = vmul.f32 %v1869_v27, %v414_v0 }
  0xc7   : > { %v398_v9 = vmul.f32 %v1855_v19, %v343_v50  ;;  %v399_v10 = vmul.f32 %v1859_v21, %v343_v50  ;;  %v618_v11 = vmul.f32 %v1863_v24, %v343_v50  ;;  %v577_v13 = vadd.f32 %v559_v44, %v487_v58 }
  0xc8   : > { %v485_v59 = vadd.f32 %v467_v53, %v395_v34  ;;  %v668_v60 = vadd.f32 %v650_v54, %v614_v36  ;;  %v484_v61 = vadd.f32 %v466_v1, %v394_v31  ;;  %v667_v62 = vadd.f32 %v649_v49, %v613_v32 }
  0xc9   : > { %v426_v33 = vpop.permute.xlu0 %425  ;;  %v576_v34 = vadd.f32 %v558_v43, %v486_v3 }
  0xca   : > { %v575_v5 = vadd.f32 %v557_v35, %v485_v59  ;;  %v722_v6 = vadd.f32 %v704_v37, %v668_v60  ;;  %v574_v7 = vadd.f32 %v556_v29, %v484_v61  ;;  %v721_v8 = vadd.f32 %v703_v30, %v667_v62 }
  0xcb   : > { %v422_v12 = vpop.permute.xlu1 %421  ;;  %v617_v29 = vmul.f32 %v1857_v20, %v343_v50  ;;  %v724_v30 = vadd.f32 %v706_v46, %v670_v2  ;;  %v723_v35 = vadd.f32 %v705_v45, %v669_v4  ;;  %v472_v38 = vmul.f32 %v1865_v25, %v426_v33 }
  0xcc   : > { %v470_v14 = vmul.f32 %v1865_v25, %v422_v12  ;;  %v471_v31 = vmul.f32 %v1861_v23, %v422_v12  ;;  %v653_v28 = vmul.f32 %v1867_v26, %v422_v12  ;;  %v654_v32 = vmul.f32 %v1869_v27, %v422_v12  ;;  %803 = vmatprep.mubr.f32.mxu0 %v575_v5 }
  0xcd   : > { %857 = vmatprep.mubr.f32.mxu1 %v722_v6  ;;  %804 = vmatmul.mubr.f32.vlgmr.msra.gmra.mrb[0].mxu0 %v574_v7  ;;  %v473_v39 = vmul.f32 %v1861_v23, %v426_v33  ;;  %v655_v40 = vmul.f32 %v1867_v26, %v426_v33  ;;  %v656_v44 = vmul.f32 %v1869_v27, %v426_v33 }
  0xce   : > { %858 = vmatmul.mubr.f32.vlgmr.msra.gmra.mrb[0].mxu1 %v721_v8  ;;  %809 = vmatprep.mubr.f32.mxu0 %v577_v13  ;;  %v489_v36 = vadd.f32 %v471_v31, %v399_v10  ;;  %v672_v37 = vadd.f32 %v654_v32, %v618_v11  ;;  %v488_v41 = vadd.f32 %v470_v14, %v398_v9 }
  0xcf   : > { %863 = vmatprep.mubr.f32.mxu1 %v724_v30  ;;  %v671_v46 = vadd.f32 %v653_v28, %v617_v29 }
  0xd0   : > { %v348_v42 = vpop.permute.xlu1 %347  ;;  %v579_v22 = vadd.f32 %v561_v56, %v489_v36  ;;  %v726_v47 = vadd.f32 %v708_v63, %v672_v37  ;;  %v578_v1 = vadd.f32 %v560_v55, %v488_v41  ;;  %v430_v63 = vpop.permute.xlu0 %429 }
  0xd1   : > { %v400_v43 = vmul.f32 %v1855_v19, %v348_v42  ;;  %v401_v45 = vmul.f32 %v1859_v21, %v348_v42  ;;  %v619_v48 = vmul.f32 %v1857_v20, %v348_v42  ;;  %v620_v0 = vmul.f32 %v1863_v24, %v348_v42  ;;  %810 = vmatmul.mubr.f32.gmra.mrb[2].mxu0 %v576_v34 }
  0xd2   : > { %864 = vmatmul.mubr.f32.gmra.mrb[2].mxu1 %v723_v35  ;;  %815 = vmatprep.mubr.f32.mxu0 %v579_v22  ;;  %v725_v49 = vadd.f32 %v707_v57, %v671_v46  ;;  %v474_v4 = vmul.f32 %v1865_v25, %v430_v63  ;;  %v475_v6 = vmul.f32 %v1861_v23, %v430_v63 }
  0xd3   : > { %869 = vmatprep.mubr.f32.mxu1 %v726_v47  ;;  %v491_v53 = vadd.f32 %v473_v39, %v401_v45  ;;  %v674_v54 = vadd.f32 %v656_v44, %v620_v0  ;;  %v490_v56 = vadd.f32 %v472_v38, %v400_v43  ;;  %v673_v58 = vadd.f32 %v655_v40, %v619_v48 }
  0xd4   : > { %v657_v7 = vmul.f32 %v1867_v26, %v430_v63  ;;  %v658_v8 = vmul.f32 %v1869_v27, %v430_v63  ;;  %v358_v35 = vpop.permute.xlu0 %357 }
  0xd5   : > { %v516_v50 = vpop.permute.xlu1 %515  ;;  %816 = vmatmul.mubr.f32.gmra.mrb[4].mxu0 %v578_v1  ;;  %v404_v40 = vmul.f32 %v1855_v19, %v358_v35  ;;  %v405_v42 = vmul.f32 %v1859_v21, %v358_v35  ;;  %v623_v44 = vmul.f32 %v1857_v20, %v358_v35  ;;  %v624_v22 = vmul.f32 %v1863_v24, %v358_v35 }
  0xd6   : > { %v562_v59 = vmul.f32 %v1847_v15, %v516_v50  ;;  %v563_v60 = vmul.f32 %v1851_v17, %v516_v50  ;;  %v709_v61 = vmul.f32 %v1849_v16, %v516_v50  ;;  %v710_v62 = vmul.f32 %v1853_v18, %v516_v50  ;;  %870 = vmatmul.mubr.f32.gmra.mrb[4].mxu1 %v725_v49 }
  0xd8   : > { %v581_v2 = vadd.f32 %v563_v60, %v491_v53  ;;  %v728_v3 = vadd.f32 %v710_v62, %v674_v54  ;;  %v580_v55 = vadd.f32 %v562_v59, %v490_v56  ;;  %v727_v57 = vadd.f32 %v709_v61, %v673_v58  ;;  %v363_v47 = vpop.permute.xlu0 %362 }
  0xd9   : > { %v406_v61 = vmul.f32 %v1855_v19, %v363_v47 }
  0xda   : > { %v353_v5 = vpop.permute.xlu1 %352  ;;  %821 = vmatprep.mubr.f32.mxu0 %v581_v2  ;;  %875 = vmatprep.mubr.f32.mxu1 %v728_v3 }
  0xdb   : > { %v402_v9 = vmul.f32 %v1855_v19, %v353_v5  ;;  %v403_v10 = vmul.f32 %v1859_v21, %v353_v5  ;;  %v621_v11 = vmul.f32 %v1857_v20, %v353_v5  ;;  %v622_v12 = vmul.f32 %v1863_v24, %v353_v5  ;;  %822 = vmatmul.mubr.f32.gmra.mrb[6].mxu0 %v580_v55 }
  0xdc   : > { %876 = vmatmul.mubr.f32.gmra.mrb[6].mxu1 %v727_v57  ;;  %v528_v60 = vpop.permute.xlu0 %527  ;;  %v407_v55 = vmul.f32 %v1859_v21, %v363_v47  ;;  %v625_v57 = vmul.f32 %v1857_v20, %v363_v47 }
  0xdd   : > { %v493_v14 = vadd.f32 %v475_v6, %v403_v10  ;;  %v676_v31 = vadd.f32 %v658_v8, %v622_v12  ;;  %v492_v28 = vadd.f32 %v474_v4, %v402_v9  ;;  %v675_v32 = vadd.f32 %v657_v7, %v621_v11 }
  0xde   : > { %v626_v4 = vmul.f32 %v1863_v24, %v363_v47  ;;  %v568_v5 = vmul.f32 %v1847_v15, %v528_v60  ;;  %v569_v7 = vmul.f32 %v1851_v17, %v528_v60  ;;  %v715_v8 = vmul.f32 %v1849_v16, %v528_v60 }
  0xdf   : > { %v520_v13 = vpop.permute.xlu1 %519  ;;  %v716_v9 = vmul.f32 %v1853_v18, %v528_v60 }
  0xe0   : > { %v564_v33 = vmul.f32 %v1847_v15, %v520_v13  ;;  %v565_v29 = vmul.f32 %v1851_v17, %v520_v13  ;;  %v711_v30 = vmul.f32 %v1849_v16, %v520_v13  ;;  %v712_v34 = vmul.f32 %v1853_v18, %v520_v13 }
  0xe2   : > { %v583_v36 = vadd.f32 %v565_v29, %v493_v14  ;;  %v730_v37 = vadd.f32 %v712_v34, %v676_v31  ;;  %v582_v38 = vadd.f32 %v564_v33, %v492_v28  ;;  %v729_v39 = vadd.f32 %v711_v30, %v675_v32 }
  0xe4   : > { %v434_v41 = vpop.permute.xlu1 %433  ;;  %827 = vmatprep.mubr.f32.mxu0 %v583_v36  ;;  %881 = vmatprep.mubr.f32.mxu1 %v730_v37  ;;  %v532_v36 = vpop.permute.xlu0 %531 }
  0xe5   : > { %v476_v46 = vmul.f32 %v1865_v25, %v434_v41  ;;  %v477_v43 = vmul.f32 %v1861_v23, %v434_v41  ;;  %v659_v45 = vmul.f32 %v1867_v26, %v434_v41  ;;  %v660_v48 = vmul.f32 %v1869_v27, %v434_v41  ;;  %828 = vmatmul.mubr.f32.gmra.mrb[8].mxu0 %v582_v38 }
  0xe6   : > { %882 = vmatmul.mubr.f32.gmra.mrb[8].mxu1 %v729_v39 }
  0xe7   : > { %v495_v1 = vadd.f32 %v477_v43, %v405_v42  ;;  %v678_v49 = vadd.f32 %v660_v48, %v624_v22  ;;  %v494_v50 = vadd.f32 %v476_v46, %v404_v40  ;;  %v677_v53 = vadd.f32 %v659_v45, %v623_v44 }
  0xe8   : > { %v446_v46 = vpop.permute.xlu0 %445  ;;  %v570_v43 = vmul.f32 %v1847_v15, %v532_v36  ;;  %v571_v45 = vmul.f32 %v1851_v17, %v532_v36  ;;  %v717_v48 = vmul.f32 %v1849_v16, %v532_v36 }
  0xe9   : > { %v524_v0 = vpop.permute.xlu1 %523 }
  0xea   : > { %v566_v54 = vmul.f32 %v1847_v15, %v524_v0  ;;  %v567_v56 = vmul.f32 %v1851_v17, %v524_v0  ;;  %v713_v58 = vmul.f32 %v1849_v16, %v524_v0  ;;  %v714_v59 = vmul.f32 %v1853_v18, %v524_v0 }
  0xeb   : > { %v718_v0 = vmul.f32 %v1853_v18, %v532_v36 }
  0xec   : > { %v585_v62 = vadd.f32 %v567_v56, %v495_v1  ;;  %v732_v63 = vadd.f32 %v714_v59, %v678_v49  ;;  %v584_v2 = vadd.f32 %v566_v54, %v494_v50  ;;  %v731_v3 = vadd.f32 %v713_v58, %v677_v53 }
  0xed   : > { %v482_v54 = vmul.f32 %v1865_v25, %v446_v46  ;;  %v483_v56 = vmul.f32 %v1861_v23, %v446_v46  ;;  %v665_v58 = vmul.f32 %v1867_v26, %v446_v46  ;;  %v666_v59 = vmul.f32 %v1869_v27, %v446_v46 }
  0xee   : > { %v438_v6 = vpop.permute.xlu1 %437  ;;  %833 = vmatprep.mubr.f32.mxu0 %v585_v62  ;;  %887 = vmatprep.mubr.f32.mxu1 %v732_v63 }
  0xef   : > { %v478_v10 = vmul.f32 %v1865_v25, %v438_v6  ;;  %v479_v11 = vmul.f32 %v1861_v23, %v438_v6  ;;  %v661_v12 = vmul.f32 %v1867_v26, %v438_v6  ;;  %v662_v13 = vmul.f32 %v1869_v27, %v438_v6  ;;  %834 = vmatmul.mubr.f32.gmra.mrb[10].mxu0 %v584_v2 }
  0xf0   : > { %888 = vmatmul.mubr.f32.gmra.mrb[10].mxu1 %v731_v3 }
  0xf1   : > { %v497_v14 = vadd.f32 %v479_v11, %v407_v55  ;;  %v680_v31 = vadd.f32 %v662_v13, %v626_v4  ;;  %v496_v28 = vadd.f32 %v478_v10, %v406_v61  ;;  %v679_v32 = vadd.f32 %v661_v12, %v625_v57 }
  0xf3   : > { %v368_v33 = vpop.permute.xlu1 %367  ;;  %v587_v29 = vadd.f32 %v569_v7, %v497_v14  ;;  %v734_v30 = vadd.f32 %v716_v9, %v680_v31  ;;  %v586_v34 = vadd.f32 %v568_v5, %v496_v28  ;;  %v733_v35 = vadd.f32 %v715_v8, %v679_v32 }
  0xf4   : > { %v408_v37 = vmul.f32 %v1855_v19, %v368_v33  ;;  %v409_v38 = vmul.f32 %v1859_v21, %v368_v33  ;;  %v627_v39 = vmul.f32 %v1857_v20, %v368_v33  ;;  %v628_v40 = vmul.f32 %v1863_v24, %v368_v33 }
  0xf5   : > { %839 = vmatprep.mubr.f32.mxu0 %v587_v29  ;;  %893 = vmatprep.mubr.f32.mxu1 %v734_v30 }
  0xf6   : > { %840 = vmatmul.mubr.f32.gmra.mrb[12].mxu0 %v586_v34  ;;  %894 = vmatmul.mubr.f32.gmra.mrb[12].mxu1 %v733_v35 }
  0xf8   : > { %v442_v41 = vpop.permute.xlu1 %441 }
  0xf9   : > { %v480_v42 = vmul.f32 %v1865_v25, %v442_v41  ;;  %v481_v44 = vmul.f32 %v1861_v23, %v442_v41  ;;  %v663_v22 = vmul.f32 %v1867_v26, %v442_v41  ;;  %v664_v47 = vmul.f32 %v1869_v27, %v442_v41 }
  0xfb   : > { %v499_v1 = vadd.f32 %v481_v44, %v409_v38  ;;  %v682_v49 = vadd.f32 %v664_v47, %v628_v40  ;;  %v498_v50 = vadd.f32 %v480_v42, %v408_v37  ;;  %v681_v53 = vadd.f32 %v663_v22, %v627_v39 }
  0xfd   : > { %v373_v60 = vpop.permute.xlu1 %372  ;;  %v589_v61 = vadd.f32 %v571_v45, %v499_v1  ;;  %v736_v62 = vadd.f32 %v718_v0, %v682_v49  ;;  %v588_v63 = vadd.f32 %v570_v43, %v498_v50  ;;  %v735_v2 = vadd.f32 %v717_v48, %v681_v53 }
  0xfe   : > { %v410_v3 = vmul.f32 %v1855_v19, %v373_v60  ;;  %v411_v55 = vmul.f32 %v1859_v21, %v373_v60  ;;  %v629_v57 = vmul.f32 %v1857_v20, %v373_v60  ;;  %v630_v4 = vmul.f32 %v1863_v24, %v373_v60 }
  0xff   : > { %845 = vmatprep.mubr.f32.mxu0 %v589_v61  ;;  %899 = vmatprep.mubr.f32.mxu1 %v736_v62 }
 0x100   : > { %846 = vmatmul.mubr.f32.gmra.mrb[14].mxu0 %v588_v63  ;;  %900 = vmatmul.mubr.f32.gmra.mrb[14].mxu1 %v735_v2  ;;  %v501_v25 = vadd.f32 %v483_v56, %v411_v55  ;;  %v684_v26 = vadd.f32 %v666_v59, %v630_v4  ;;  %v500_v27 = vadd.f32 %v482_v54, %v410_v3 }
 0x101   : > { %v683_v5 = vadd.f32 %v665_v58, %v629_v57 }
 0x102   : > { %v536_v23 = vpop.permute.xlu1 %535 }
 0x103   : > { %v572_v6 = vmul.f32 %v1847_v15, %v536_v23  ;;  %v573_v19 = vmul.f32 %v1851_v17, %v536_v23  ;;  %v719_v21 = vmul.f32 %v1849_v16, %v536_v23  ;;  %v720_v20 = vmul.f32 %v1853_v18, %v536_v23 }
 0x105   : > { %v591_v7 = vadd.f32 %v573_v19, %v501_v25  ;;  %v738_v24 = vadd.f32 %v720_v20, %v684_v26  ;;  %v590_v8 = vadd.f32 %v572_v6, %v500_v27  ;;  %v737_v9 = vadd.f32 %v719_v21, %v683_v5 }
 0x107   : > { %851 = vmatprep.mubr.f32.mxu0 %v591_v7  ;;  %905 = vmatprep.mubr.f32.mxu1 %v738_v24  ;;  %v1979_v10 = vpop.permute.xlu1 %995 }
 0x108   : > { %852 = vmatmul.mubr.f32.gmra.mrb[16].mxu0 %v590_v8  ;;  %906 = vmatmul.mubr.f32.gmra.mrb[16].mxu1 %v737_v9 }
 0x10b   : > { %v929_v17 = vpop.permute.xlu1 %928 }
 0x10f   : > { %v934_v29 = vpop.permute.xlu1 %933 }
 0x113   : > { %v939_v42 = vpop.permute.xlu1 %938 }
 0x117   : > { %v944_v1 = vpop.permute.xlu1 %943 }
 0x11b   : > { %v949_v61 = vpop.permute.xlu1 %948 }
 0x11f   : > { %v954_v25 = vpop.permute.xlu1 %953 }
 0x1a0   : > { %v1984_v15 = vpop.f32.mrb[0].mxu0 }
 0x1a1   : > { %v1986_v11 = vpop.f32.mrb[0].mxu1  ;;  %v1988_v16 = vpop.f32.mrb[1].mxu0 }
 0x1a2   : > { %v1991_v18 = vpop.f32.mrb[1].mxu1 }
 0x1a4   : > { %v811_v12 = vpop.f32.mrb[2].mxu0 }
 0x1a5   : > { %v963_v13 = vadd.f32 %v929_v17, %v811_v12  ;;  %v865_v14 = vpop.f32.mrb[2].mxu1  ;;  %v813_v31 = vpop.f32.mrb[3].mxu0 }
 0x1a6   : > { %v1040_v28 = vadd.f32 %v929_v17, %v865_v14  ;;  %v964_v32 = vadd.f32 %v929_v17, %v813_v31  ;;  %v867_v33 = vpop.f32.mrb[3].mxu1 }
 0x1a7   : > { %979 = vst [vmem:[%s1993_s12 + $0x10] sm:$0xff] %v963_v13  ;;  %v1041_v30 = vadd.f32 %v929_v17, %v867_v33 }
 0x1a8   : > { %1264 = vst [vmem:[%s1993_s12 + $0x90] sm:$0xff] %v1040_v28  ;;  %980 = vst [vmem:[%s1993_s12 + $0x18] sm:$0xff] %v964_v32  ;;  %v817_v34 = vpop.f32.mrb[4].mxu0 }
 0x1a9   : > { %1265 = vst [vmem:[%s1993_s12 + $0x98] sm:$0xff] %v1041_v30  ;;  %v965_v35 = vadd.f32 %v934_v29, %v817_v34  ;;  %v871_v36 = vpop.f32.mrb[4].mxu1  ;;  %v819_v37 = vpop.f32.mrb[5].mxu0 }
 0x1aa   : > { %v1042_v38 = vadd.f32 %v934_v29, %v871_v36  ;;  %v966_v39 = vadd.f32 %v934_v29, %v819_v37  ;;  %v873_v40 = vpop.f32.mrb[5].mxu1 }
 0x1ab   : > { %981 = vst [vmem:[%s1993_s12 + $0x20] sm:$0xff] %v965_v35  ;;  %v1043_v41 = vadd.f32 %v934_v29, %v873_v40 }
 0x1ac   : > { %1266 = vst [vmem:[%s1993_s12 + $0xa0] sm:$0xff] %v1042_v38  ;;  %982 = vst [vmem:[%s1993_s12 + $0x28] sm:$0xff] %v966_v39 }
 0x1ad   : > { %1267 = vst [vmem:[%s1993_s12 + $0xa8] sm:$0xff] %v1043_v41 }
 0x1ae   : > { %v823_v44 = vpop.f32.mrb[6].mxu0 }
 0x1af   : > { %v967_v22 = vadd.f32 %v939_v42, %v823_v44  ;;  %v877_v47 = vpop.f32.mrb[6].mxu1  ;;  %v825_v46 = vpop.f32.mrb[7].mxu0  ;;  %v912_v44 = vld [vmem:[%s2157_s3] sm:$0xff] }
 0x1b0   : > { %v1044_v43 = vadd.f32 %v939_v42, %v877_v47  ;;  %v968_v45 = vadd.f32 %v939_v42, %v825_v46  ;;  %v879_v48 = vpop.f32.mrb[7].mxu1 }
 0x1b1   : > { %983 = vst [vmem:[%s1993_s12 + $0x30] sm:$0xff] %v967_v22  ;;  %v1045_v0 = vadd.f32 %v939_v42, %v879_v48  ;;  %v919_v42 = vld [vmem:[%s2157_s3 + $0x38] sm:$0xff] }
 0x1b2   : > { %1268 = vst [vmem:[%s1993_s12 + $0xb0] sm:$0xff] %v1044_v43  ;;  %984 = vst [vmem:[%s1993_s12 + $0x38] sm:$0xff] %v968_v45 }
 0x1b3   : > { %1269 = vst [vmem:[%s1993_s12 + $0xb8] sm:$0xff] %v1045_v0 }
 0x1b8   : > { %v829_v49 = vpop.f32.mrb[8].mxu0 }
 0x1b9   : > { %v969_v50 = vadd.f32 %v944_v1, %v829_v49  ;;  %v883_v53 = vpop.f32.mrb[8].mxu1  ;;  %v831_v54 = vpop.f32.mrb[9].mxu0 }
 0x1ba   : > { %v1046_v56 = vadd.f32 %v944_v1, %v883_v53  ;;  %v970_v58 = vadd.f32 %v944_v1, %v831_v54  ;;  %v885_v59 = vpop.f32.mrb[9].mxu1 }
 0x1bb   : > { %985 = vst [vmem:[%s1993_s12 + $0x40] sm:$0xff] %v969_v50  ;;  %v1047_v60 = vadd.f32 %v944_v1, %v885_v59  ;;  %v1617_v59 = vmov 1966171168  }
 0x1bc   : > { %1270 = vst [vmem:[%s1993_s12 + $0xc0] sm:$0xff] %v1046_v56  ;;  %986 = vst [vmem:[%s1993_s12 + $0x48] sm:$0xff] %v970_v58 }
 0x1bd   : > { %1271 = vst [vmem:[%s1993_s12 + $0xc8] sm:$0xff] %v1047_v60  ;;  %v1019_v60 = vunpack.c.l.s4 %v1617_v59 }
 0x1c2   : > { %v835_v62 = vpop.f32.mrb[10].mxu0 }
 0x1c3   : > { %v971_v63 = vadd.f32 %v949_v61, %v835_v62  ;;  %v889_v2 = vpop.f32.mrb[10].mxu1  ;;  %v837_v3 = vpop.f32.mrb[11].mxu0 }
 0x1c4   : > { %v1048_v55 = vadd.f32 %v949_v61, %v889_v2  ;;  %v972_v57 = vadd.f32 %v949_v61, %v837_v3  ;;  %v891_v4 = vpop.f32.mrb[11].mxu1 }
 0x1c5   : > { %987 = vst [vmem:[%s1993_s12 + $0x50] sm:$0xff] %v971_v63  ;;  %v1049_v23 = vadd.f32 %v949_v61, %v891_v4 }
 0x1c6   : > { %1272 = vst [vmem:[%s1993_s12 + $0xd0] sm:$0xff] %v1048_v55  ;;  %988 = vst [vmem:[%s1993_s12 + $0x58] sm:$0xff] %v972_v57 }
 0x1c7   : > { %1273 = vst [vmem:[%s1993_s12 + $0xd8] sm:$0xff] %v1049_v23 }
 0x1c9   : > { %v841_v26 = vpop.f32.mrb[12].mxu0  ;;  %v895_v27 = vpop.f32.mrb[12].mxu1 }
 0x1ca   : > { %v973_v5 = vadd.f32 %v954_v25, %v841_v26  ;;  %v1050_v6 = vadd.f32 %v954_v25, %v895_v27  ;;  %v843_v19 = vpop.f32.mrb[13].mxu0  ;;  %v897_v21 = vpop.f32.mrb[13].mxu1 }
 0x1cb   : > { %v974_v20 = vadd.f32 %v954_v25, %v843_v19  ;;  %v1051_v7 = vadd.f32 %v954_v25, %v897_v21 }
 0x1cc   : > { %989 = vst [vmem:[%s1993_s12 + $0x60] sm:$0xff] %v973_v5  ;;  %1274 = vst [vmem:[%s1993_s12 + $0xe0] sm:$0xff] %v1050_v6 }
 0x1cd   : > { %990 = vst [vmem:[%s1993_s12 + $0x68] sm:$0xff] %v974_v20  ;;  %1275 = vst [vmem:[%s1993_s12 + $0xe8] sm:$0xff] %v1051_v7 }
 0x1d3   : > { %v847_v24 = vpop.f32.mrb[14].mxu0  ;;  %v901_v8 = vpop.f32.mrb[14].mxu1 }
 0x1d4   : > { %v849_v9 = vpop.f32.mrb[15].mxu0  ;;  %v903_v17 = vpop.f32.mrb[15].mxu1 }
 0x1db   : > { %v853_v12 = vpop.f32.mrb[16].mxu0  ;;  %v907_v13 = vpop.f32.mrb[16].mxu1 }
 0x1dc   : > { %v2020_v14 = vadd.f32 %v1979_v10, %v853_v12  ;;  %v2023_v31 = vadd.f32 %v1979_v10, %v907_v13  ;;  %v855_v28 = vpop.f32.mrb[17].mxu0  ;;  %v909_v32 = vpop.f32.mrb[17].mxu1 }
 0x1dd   : > { %v2026_v33 = vadd.f32 %v1979_v10, %v855_v28  ;;  %v2029_v29 = vadd.f32 %v1979_v10, %v909_v32 }
 0x1de   : > { %v1000_v30 = vmax.f32 %v2020_v14, 0.0  ;;  %v1073_v34 = vmax.f32 %v2023_v31, 0.0 }
 0x1df   : > { %v1001_v35 = vmax.f32 %v2026_v33, 0.0  ;;  %v1074_v36 = vmax.f32 %v2029_v29, 0.0 }
 0x1e0   : > { %v1075_v37 = vsel %vm1002_vm0, %v1073_v34, -inf  ;;  %v1003_v38 = vsel %vm1002_vm0, %v1000_v30, -inf }
 0x1e1   : > { %v1076_v39 = vsel %vm1002_vm0, %v1074_v36, -inf  ;;  %v1004_v10 = vsel %vm1002_vm0, %v1001_v35, -inf }
 0x1e2   : > { %v1077_v40 = vmax.f32 %v1075_v37, %v1076_v39  ;;  %v1005_v41 = vmax.f32 %v1003_v38, %v1004_v10 }
 0x1e4   : > { %1078 = vmax.xlane.f32.xlu1 %v1077_v40  ;;  %1006 = vmax.xlane.f32.xlu0 %v1005_v41 }
 0x1f5   : > { %958 = vperm.xlu1 %1477, %v919_v42  }
 0x1fa   : > { %923 = vperm.xlu0 %1478, %v912_v44  }
 0x271   : > { %v1079_v22 = vpop.xlane.xlu1 %1078  ;;  %v1007_v47 = vpop.xlane.xlu0 %1006 }
 0x272   : > { %v1080_v46 = vadd.f32 1e-08, %v1079_v22  ;;  %v1008_v43 = vadd.f32 1e-08, %v1007_v47 }
 0x274   : > { %1479 = vrcp.f32 %v1080_v46 }
 0x275   : > { %1481 = vrcp.f32 %v1008_v43  ;;  %v959_v45 = vpop.permute.xlu1 %958 }
 0x276   : > { %v975_v48 = vadd.f32 %v959_v45, %v847_v24  ;;  %v976_v0 = vadd.f32 %v959_v45, %v849_v9  ;;  %v1052_v1 = vadd.f32 %v959_v45, %v901_v8  ;;  %v1053_v49 = vadd.f32 %v959_v45, %v903_v17 }
 0x278   : > { %991 = vst [vmem:[%s1993_s12 + $0x70] sm:$0xff] %v975_v48  ;;  %992 = vst [vmem:[%s1993_s12 + $0x78] sm:$0xff] %v976_v0 }
 0x279   : > { %1276 = vst [vmem:[%s1993_s12 + $0xf0] sm:$0xff] %v1052_v1  ;;  %1277 = vst [vmem:[%s1993_s12 + $0xf8] sm:$0xff] %v1053_v49  ;;  %v924_v50 = vpop.permute.xlu0 %923 }
 0x27a   : > { %v961_v53 = vadd.f32 %v924_v50, %v1984_v15  ;;  %v962_v54 = vadd.f32 %v924_v50, %v1988_v16  ;;  %v1038_v56 = vadd.f32 %v924_v50, %v1986_v11  ;;  %v1039_v58 = vadd.f32 %v924_v50, %v1991_v18 }
 0x27c   : > { %977 = vst [vmem:[%s1993_s12] sm:$0xff] %v961_v53  ;;  %978 = vst [vmem:[%s1993_s12 + $0x8] sm:$0xff] %v962_v54 }
 0x27d   : > { %1262 = vst [vmem:[%s1993_s12 + $0x80] sm:$0xff] %v1038_v56  ;;  %1263 = vst [vmem:[%s1993_s12 + $0x88] sm:$0xff] %v1039_v58 }
 0x27e   : > { %1524 = shalt.err (!%p1521_p7)
}
 0x27f   : > { %s1525_s12 = scalar_lea.hbm %s2058_s6, 4096  ;;  %s1529_s15 = scalar_lea.hbm %s2158_s4, 8192 }
 0x280   : > { %p1526_p8 = scmp.ne.s32.totalorder %s2058_s6, %s1525_s12  ;;  %p1530_p1 = scmp.lt.u32.totalorder %s2058_s6, %s2158_s4 }
 0x281   : > { %p1531_p0 = scmp.lt.u32.totalorder %s1529_s15, %s1525_s12  ;;  %p1533_p6 = scmp.lt.u32.totalorder %s1525_s12, %s2058_s6 }
 0x282   : > { %p1527_p11 = pnand %p1526_p8, %p2170_p9 }
 0x283   : > { %p1532_p5 = por %p1531_p0, %p1530_p1 }
 0x284   : > { %p1528_p13 = pneg %p1527_p11 }
 0x285   : > { %p1534_p10 = por %p1533_p6, %p1532_p5 }
 0x287   : > { %p1535_p12 = pnand %p1534_p10, %p1528_p13 }
 0x289   : > { %1538 = shalt.err (!%p1535_p12)
}
 0x28a   : > { %s1619_s25 = smov 256   ;;  %s1620_s26 = smov 16   ;;  %v1480_v15 = vpop.eup %1479  ;;  %v1020_v16 = vunpack.c.0.s8 %v1019_v60  ;;  %vm1035_vm1 = vcmp.lt.s32.totalorder %v376_v51, 256 }
 0x28b   : > { %1394 = dma.vmem_to_hbm [thread:$0]  (%p2170_p9), %s2060_s23, 4096, %s2058_s6, %s1108_s8, %s1619_s25, %s1619_s25, %s1620_s26   ;;  %v1482_v11 = vpop.eup %1481  ;;  %v1082_v18 = vmul.f32 4.0, %v1480_v15 }
 0x28c   : > { %v1010_v61 = vmul.f32 4.0, %v1482_v11  ;;  %s1257_s30 = sshll.u32 %s1982_s10, 2  ;;  %v1023_v55 = vsub.s32 %v1020_v16, %v1836_v52  ;;  %s1293_s23 = sshll.u32 %s1675_s22, 6 }
 0x28d   : > { %v1083_v62 = vmul.f32 %v1082_v18, %v1073_v34  ;;  %v1084_v63 = vmul.f32 %v1082_v18, %v1074_v36  ;;  %s246_s6 = scalar_lea.vmem [#allocation6], %s1257_s30  ;;  %s2109_s11 = scalar_lea.hbm %s2159_s5, %s1293_s23 }
 0x28e   : > { %v1011_v2 = vmul.f32 %v1010_v61, %v1000_v30  ;;  %v1012_v3 = vmul.f32 %v1010_v61, %v1001_v35  ;;  %s1144_s8 = sshll.u32 %s246_s6, 4  ;;  %s1113_s22 = scalar_lea.sflag [#allocation7], %s1982_s10  ;;  %s2111_s8 = int_to_ptr.vmem [resolvable:$true] %s1144_s8 }
 0x28f   : > { %v1085_v57 = vadd.f32 0.01, %v1083_v62  ;;  %v1086_v4 = vadd.f32 0.01, %v1084_v63  ;;  %s1539_s12 = scalar_lea.vmem %s2111_s8, 64  ;;  %s1621_s13 = smov [#allocation6]  }
 0x290   : > { %v1013_v23 = vadd.f32 0.01, %v1011_v2  ;;  %v1014_v25 = vadd.f32 0.01, %v1012_v3  ;;  %p1540_p2 = scmp.ne.s32.totalorder %s2111_s8, %s1539_s12  ;;  %s1543_s14 = sshll.u32 %s1621_s13, 4  ;;  %s1544_s14 = int_to_ptr.vmem [resolvable:$false] %s1543_s14 }
 0x291   : > { %v1089_v26 = vcombine.low %v1085_v57, %v1086_v4  ;;  %s1545_s15 = scalar_lea.vmem %s1544_s14, 128  ;;  %p1546_p7 = scmp.lt.s32.totalorder %s2111_s8, %s1544_s14 }
 0x292   : > { %v1017_v27 = vcombine.low %v1013_v23, %v1014_v25  ;;  %p1541_p3 = pnand %p1540_p2, %p2170_p9  ;;  %p1547_p8 = scmp.lt.s32.totalorder %s1545_s15, %s1539_s12 }
 0x293   : > { %v1096_v5 = vrot.slane %v1089_v26, %v1023_v55 }
 0x294   : > { %v1024_v6 = vrot.slane %v1017_v27, %v1023_v55  ;;  %p1542_p4 = pneg %p1541_p3  ;;  %p1548_p11 = por %p1547_p8, %p1546_p7 }
 0x295   : > { %v1103_v19 = vrot.slane %v1096_v5, %v1023_v55 }
 0x296   : > { %v1031_v52 = vrot.slane %v1024_v6, %v1023_v55  ;;  %p1549_p13 = pnand %p1548_p11, %p1542_p4 }
 0x297   : > { %1278 = vst.msk [vmem:[%s246_s6 + $0x2] sm:$0x3] %vm1035_vm1, %v1103_v19 }
 0x298   : > { %1037 = vst.msk [vmem:[%s246_s6] sm:$0x3] %vm1035_vm1, %v1031_v52 }
 0x299   : > { %1552 = shalt.err (!%p1549_p13)
}
 0x29a   : > { %s1553_s16 = scalar_lea.hbm %s2109_s11, 64  ;;  %s1557_s26 = scalar_lea.hbm %s2159_s5, 128 }
 0x29b   : > { %p1554_p1 = scmp.ne.s32.totalorder %s2109_s11, %s1553_s16  ;;  %p1558_p6 = scmp.lt.u32.totalorder %s2109_s11, %s2159_s5 }
 0x29c   : > { %p1559_p10 = scmp.lt.u32.totalorder %s1557_s26, %s1553_s16  ;;  %p1561_p2 = scmp.lt.u32.totalorder %s1553_s16, %s2109_s11 }
 0x29d   : > { %p1555_p0 = pnand %p1554_p1, %p2170_p9 }
 0x29e   : > { %p1560_p12 = por %p1559_p10, %p1558_p6 }
 0x29f   : > { %p1556_p5 = pneg %p1555_p0 }
 0x2a0   : > { %p1562_p3 = por %p1561_p2, %p1560_p12 }
 0x2a2   : > { %p1563_p4 = pnand %p1562_p3, %p1556_p5 }
 0x2a4   : > { %1566 = shalt.err (!%p1563_p4)
}
 0x2a5   : > { %s1622_s6 = smov 32   ;;  %s1623_s7 = smov 2  }
 0x2a6   : > { %1395 = dma.vmem_to_hbm [thread:$0]  (%p2170_p9), %s2111_s8, 64, %s2109_s11, %s1113_s22, %s1622_s6, %s1622_s6, %s1623_s7  }
 0x2a7 PF: > { %p1411_p7 = scmp.ge.s32.totalorder %s1609_s21, 2  ;;  %s1159_s9 = sand.u32 1, %s1597_s18  }
 0x2a8   : > { %p2171_p8 = scmp.ne.s32.totalorder %s2164_s29, 0  ;;  %s1160_s12 = scalar_lea.sflag [#allocation4], %s1159_s9 }
 0x2aa   : > { %p1403_p11 = pnand %p1411_p7, %p2171_p8 }
 0x2ac   : > { %1588 = dma.done.wait (!%p1403_p11), %s1160_s12, 4096  }
 0x2ad   : > { %1590 = vsyncadd (!%p1403_p11), %s1160_s12, 4294963200  ;;  %s1169_s13 = scalar_lea.sflag [#allocation7], %s1159_s9 }
 0x2ae   : > { %1592 = dma.done.wait (!%p1403_p11), %s1169_s13, 64  }
 0x2af   : > { %1594 = vsyncadd (!%p1403_p11), %s1169_s13, 4294967232  ;;  %p20_p9 = scmp.ge.s32.totalorder %s1679_s24, 4   ;;  %s2172_s18 = smov %s1601_s19 }
 0x2b0   : > { %s2173_s19 = smov %s1605_s20  ;;  %s2174_s20 = smov %s1690_s27 }
 0x2b1   : > { %s2175_s21 = smov %s1679_s24  ;;  %22 = sbr.rel (!%p20_p9) target bundleno = 6 (0x6), region = 96 }
 0x2b8   :  { %1174 = vsyncpa [#allocation3], 1 }
 0x2b9   :  { %1176 = vsyncpa [#allocation3 + $0x1], 1 }
 0x2ba   :  { %1177 = vsyncpa [#allocation4], 1 }
 0x2bb   :  { %1179 = vsyncpa [#allocation4 + $0x1], 1 }
 0x2bc   :  { %1180 = vsyncpa [#allocation7], 1 }
 0x2bd   :  { %1182 = vsyncpa [#allocation7 + $0x1], 1 }

</bundles_post_ra>
